<compile_context>
chip_gen: v7x
topology: tpu7x:2x2x1
jax: 0.10.0
libtpu: 0.0.40
codegen_flags: <defaults>
</compile_context>

<pallas_src>
import jax
import jax.numpy as jnp
from jax import lax
from jax.experimental import pallas as pl
from jax.experimental.pallas import tpu as pltpu


# ----------------------------------------------------------------------------
# helpers
# ----------------------------------------------------------------------------
def _ceil_to(x, m):
    return (x + m - 1) // m * m


def _pad_to(a, shape):
    pads = [(0, s - d) for d, s in zip(a.shape, shape)]
    return jnp.pad(a, pads)


def _vmem_budget_bytes():
    """Per-generation VMEM budget (v5e/v6e: 128 MiB -> 96; v7x: 64 -> 48)."""
    try:
        cap = int(pltpu.get_tpu_info().vmem_capacity_bytes)
    except Exception:
        cap = 64 * 1024 * 1024
    return min(cap * 3 // 4, 96 * 1024 * 1024)


def _vmem_estimate_bytes(t_block, b_block, D0p, H_pad, O_pad, n_layers, wt_bytes):
    x_blk = 2 * t_block * b_block * D0p * wt_bytes            # double-buffered in
    out_blk = 2 * t_block * b_block * O_pad * 4                # double-buffered out
    carries = 2 * 2 * n_layers * b_block * H_pad * 4           # h0 + hT blocks
    weights = 2 * wt_bytes * (D0p * H_pad
                              + (2 * n_layers - 1) * H_pad * H_pad
                              + H_pad * O_pad)
    biases = 2 * 4 * (n_layers * H_pad + O_pad)
    stages = min(n_layers, 2) * t_block * b_block * H_pad * 4  # ping-pong scratch
    return x_blk + out_blk + carries + weights + biases + stages


# ----------------------------------------------------------------------------
# fused kernel: all RNN layers + fc head, one pallas_call
# ----------------------------------------------------------------------------
def _make_fused_rnn_kernel(*, n_layers, seq_len, t_block, wt_dtype, needs_mask,
                           unroll):
    def kernel(*refs):
        i = 0
        x_ref = refs[i]; i += 1
        wih0_ref = refs[i]; i += 1
        wihr_ref = None
        if n_layers > 1:
            wihr_ref = refs[i]; i += 1
        whh_ref = refs[i]; i += 1
        b_ref = refs[i]; i += 1
        h0_ref = refs[i]; i += 1
        wfc_ref = refs[i]; i += 1
        bfc_ref = refs[i]; i += 1
        out_ref = refs[i]; i += 1
        hT_ref = refs[i]; i += 1
        stages = list(refs[i:])            # 1 (L==1) or 2 ping-pong VMEM buffers

        tb = pl.program_id(1)              # time-block index ("arbitrary" axis)
        n_t = pl.num_programs(1)
        Tt, Bb, _ = x_ref.shape
        H = whh_ref.shape[-1]

        # hT's index map is constant along the time axis -> resident carry.
        @pl.when(tb == 0)
        def _():
            hT_ref[...] = h0_ref[...]

        def run_layer(l, cur_ref, masked):
            # Serial recurrence for layer l; gates already staged in cur_ref.
            # Only h @ W_hh + gates[t] -> tanh -> store is on the critical path.
            whh = whh_ref[l]
            base = tb * t_block

            def step(t, h):
                hn = jnp.tanh(
                    jnp.dot(h.astype(wt_dtype), whh,
                            preferred_element_type=jnp.float32)
                    + cur_ref[t])
                if masked:                       # ragged last block only
                    hn = jnp.where(base + t < seq_len, hn, h)
                cur_ref[t] = hn
                return hn

            hT_ref[l] = lax.fori_loop(0, Tt, step, hT_ref[l], unroll=unroll)

        for l in range(n_layers):
            cur_ref = stages[l % len(stages)]
            if l == 0:
                src = x_ref[...]                                   # wt_dtype
                w = wih0_ref[...]
            else:
                src = stages[(l - 1) % len(stages)][...].astype(wt_dtype)
                w = wihr_ref[l - 1]
            K = src.shape[-1]
            # Hoisted input projection: ONE (Tt*Bb, K) @ (K, H) matmul per
            # block; fused bias added once (f32 accumulation).
            gates = (jnp.dot(src.reshape(Tt * Bb, K), w,
                             preferred_element_type=jnp.float32)
                     + b_ref[l])
            cur_ref[...] = gates.reshape(Tt, Bb, H)

            if needs_mask:
                @pl.when(tb != n_t - 1)
                def _(l=l, cur_ref=cur_ref):
                    run_layer(l, cur_ref, masked=False)

                @pl.when(tb == n_t - 1)
                def _(l=l, cur_ref=cur_ref):
                    run_layer(l, cur_ref, masked=True)
            else:
                run_layer(l, cur_ref, masked=False)

        # Fused fc head: one (Tt*Bb, H) @ (H, O) matmul, lane-dense store.
        last_ref = stages[(n_layers - 1) % len(stages)]
        O = out_ref.shape[-1]
        out = (jnp.dot(last_ref[...].astype(wt_dtype).reshape(Tt * Bb, H),
                       wfc_ref[...], preferred_element_type=jnp.float32)
               + bfc_ref[...])
        out_ref[...] = out.reshape(Tt, Bb, O).astype(out_ref.dtype)

    return kernel


# ----------------------------------------------------------------------------
# parameter preparation (transpose + pad + optional bf16 cast, ONCE)
# ----------------------------------------------------------------------------
def init_params(key, input_size, output_size, hidden_dim, n_layers):
    params = {"rnn": [], "fc": None}
    k = 1.0 / jnp.sqrt(hidden_dim)
    for l in range(n_layers):
        d_in = input_size if l == 0 else hidden_dim
        key, k1, k2, k3, k4 = jax.random.split(key, 5)
        wih = jax.random.uniform(k1, (hidden_dim, d_in), jnp.float32, -k, k)
        whh = jax.random.uniform(k2, (hidden_dim, hidden_dim), jnp.float32, -k, k)
        bih = jax.random.uniform(k3, (hidden_dim,), jnp.float32, -k, k)
        bhh = jax.random.uniform(k4, (hidden_dim,), jnp.float32, -k, k)
        params["rnn"].append((wih, whh, bih, bhh))
    key, k1, k2 = jax.random.split(key, 3)
    w_fc = jax.random.uniform(k1, (output_size, hidden_dim), jnp.float32, -k, k)
    b_fc = jax.random.uniform(k2, (output_size,), jnp.float32, -k, k)
    params["fc"] = (w_fc, b_fc)
    return params


def prepare_params(params, hidden_dim, output_size, *, wt_dtype=jnp.float32):
    """Pre-transpose, pad and (optionally) down-cast all weights once."""
    H_pad = _ceil_to(hidden_dim, 128)
    O_pad = _ceil_to(output_size, 128)
    sub = 8 if jnp.dtype(wt_dtype).itemsize >= 4 else 16

    wihs = [w for (w, _, _, _) in params["rnn"]]
    whhs = [w for (_, w, _, _) in params["rnn"]]
    bs = [bih + bhh for (_, _, bih, bhh) in params["rnn"]]
    n_layers = len(wihs)

    d_in = wihs[0].shape[1]
    D0p = _ceil_to(d_in, sub)           # compact: sublane-align only, no 128-lane pad
    wih0 = _pad_to(wihs[0].T, (D0p, H_pad)).astype(wt_dtype)
    wih_rest = None
    if n_layers > 1:
        wih_rest = jnp.stack(
            [_pad_to(w.T, (H_pad, H_pad)) for w in wihs[1:]]).astype(wt_dtype)
    whh_all = jnp.stack(
        [_pad_to(w.T, (H_pad, H_pad)) for w in whhs]).astype(wt_dtype)
    b_all = jnp.stack(
        [_pad_to(b[None, :], (1, H_pad)) for b in bs]).astype(jnp.float32)

    w_fc, b_fc = params["fc"]
    wfc = _pad_to(w_fc.T, (H_pad, O_pad)).astype(wt_dtype)
    bfc = _pad_to(b_fc[None, :], (1, O_pad)).astype(jnp.float32)

    return dict(wih0=wih0, wih_rest=wih_rest, whh=whh_all, b=b_all, wfc=wfc,
                bfc=bfc, d_in=d_in, D0p=D0p, H_pad=H_pad, O_pad=O_pad,
                n_layers=n_layers, wt_dtype=wt_dtype)


# ----------------------------------------------------------------------------
# forward pass (mirrors RNN.forward of the PyTorch module)
# ----------------------------------------------------------------------------
def rnn_forward_pallas(prepped, x, hidden, hidden_dim, output_size, *,
                       t_block=64, b_block=None, num_tensorcores=1):
    """x: (B, T, input_size) batch-first.  hidden: (n_layers, B, hidden_dim)."""
    B, T, d_in = x.shape
    L = prepped["n_layers"]
    H_pad, O_pad, D0p = prepped["H_pad"], prepped["O_pad"], prepped["D0p"]
    wt_dtype = prepped["wt_dtype"]
    wt_bytes = jnp.dtype(wt_dtype).itemsize
    assert d_in == prepped["d_in"]

    # ---- block-size selection, bounded by the per-generation VMEM budget ----
    b_align = 8 if wt_bytes >= 4 else 16
    B_pad = _ceil_to(max(B, b_align), b_align)
    if b_block is None:
        b_block = min(128, B_pad)
        # v7x: force at least 2 batch blocks so the second TC gets work.
        if num_tensorcores > 1 and B_pad // b_block < 2 and B_pad >= 2 * b_align:
            b_block = _ceil_to(B_pad // 2, b_align)
    B_pad = _ceil_to(B_pad, b_block)

    budget = _vmem_budget_bytes()
    t_block = max(1, min(t_block, T))
    while (t_block > 8 and
           _vmem_estimate_bytes(t_block, b_block, D0p, H_pad, O_pad, L,
                                wt_bytes) > 0.8 * budget):
        t_block //= 2
    T_pad = _ceil_to(T, t_block)
    needs_mask = (T_pad != T)
    n_b, n_t = B_pad // b_block, T_pad // t_block
    unroll = True if t_block <= 8 else 8

    # ---- one-time layout conversion: batch-first -> padded time-major -------
    x_tm = _pad_to(jnp.transpose(x, (1, 0, 2)).astype(wt_dtype),
                   (T_pad, B_pad, D0p))
    h0 = _pad_to(hidden.astype(jnp.float32), (L, B_pad, H_pad))

    kernel = _make_fused_rnn_kernel(n_layers=L, seq_len=T, t_block=t_block,
                                    wt_dtype=wt_dtype, needs_mask=needs_mask,
                                    unroll=unroll)

    const2 = lambda bb, tb: (0, 0)
    const3 = lambda bb, tb: (0, 0, 0)
    in_specs = [pl.BlockSpec((t_block, b_block, D0p), lambda bb, tb: (tb, bb, 0)),
                pl.BlockSpec((D0p, H_pad), const2)]
    inputs = [x_tm, prepped["wih0"]]
    if L > 1:
        in_specs.append(pl.BlockSpec((L - 1, H_pad, H_pad), const3))
        inputs.append(prepped["wih_rest"])
    in_specs += [pl.BlockSpec((L, H_pad, H_pad), const3),
                 pl.BlockSpec((L, 1, H_pad), const3),
                 pl.BlockSpec((L, b_block, H_pad), lambda bb, tb: (0, bb, 0)),
                 pl.BlockSpec((H_pad, O_pad), const2),
                 pl.BlockSpec((1, O_pad), const2)]
    inputs += [prepped["whh"], prepped["b"], h0, prepped["wfc"], prepped["bfc"]]

    out_shape = (jax.ShapeDtypeStruct((T_pad, B_pad, O_pad), jnp.float32),
                 jax.ShapeDtypeStruct((L, B_pad, H_pad), jnp.float32))
    out_specs = (pl.BlockSpec((t_block, b_block, O_pad), lambda bb, tb: (tb, bb, 0)),
                 pl.BlockSpec((L, b_block, H_pad), lambda bb, tb: (0, bb, 0)))
    scratch = [pltpu.VMEM((t_block, b_block, H_pad), jnp.float32)
               for _ in range(min(L, 2))]

    out_fc, hT = pl.pallas_call(
        kernel,
        grid=(n_b, n_t),
        in_specs=in_specs,
        out_specs=out_specs,
        out_shape=out_shape,
        scratch_shapes=scratch,
        compiler_params=pltpu.CompilerParams(
            dimension_semantics=("parallel", "arbitrary"),
            vmem_limit_bytes=int(budget)),
    )(*inputs)

    # valid slice -> (B*T, output_size), matching out1.view(-1, H) @ fc order.
    out = jnp.transpose(out_fc[:T, :B, :output_size], (1, 0, 2))
    out = out.reshape(B * T, output_size)
    return out, hT[:, :B, :hidden_dim]


# ----------------------------------------------------------------------------
# pure-JAX reference for correctness checking
# ----------------------------------------------------------------------------
def rnn_forward_ref(params, x, hidden, hidden_dim, n_layers):
    layer_in = x
    h_finals = []
    for l in range(n_layers):
        wih, whh, bih, bhh = params["rnn"][l]
        h = hidden[l]
        outs = []
        for t in range(x.shape[1]):
            h = jnp.tanh(layer_in[:, t, :] @ wih.T + bih + h @ whh.T + bhh)
            outs.append(h)
        layer_in = jnp.stack(outs, axis=1)
        h_finals.append(h)
    out2 = layer_in.reshape(-1, hidden_dim)
    w_fc, b_fc = params["fc"]
    return out2 @ w_fc.T + b_fc, jnp.stack(h_finals, axis=0)


if __name__ == "__main__":
    B, T = 2, 8
    input_size, output_size, hidden_dim, n_layers = 16, 10, 32, 2

    key = jax.random.PRNGKey(0)
    key, kx = jax.random.split(key)
    params = init_params(key, input_size, output_size, hidden_dim, n_layers)

    x = jax.random.normal(kx, (B, T, input_size), jnp.float32)
    hidden0 = jnp.zeros((n_layers, B, hidden_dim), jnp.float32)   # init_hidden

    out_ref_, hidden_ref_ = rnn_forward_ref(params, x, hidden0, hidden_dim,
                                            n_layers)

    # --- f32 weights, t_block=4 -> 2 time blocks (exercises the hT carry) ---
    prepped32 = prepare_params(params, hidden_dim, output_size,
                               wt_dtype=jnp.float32)
    out, hid = rnn_forward_pallas(prepped32, x, hidden0, hidden_dim,
                                  output_size, t_block=4)
    out = jax.block_until_ready(out)
    hid = jax.block_until_ready(hid)
    assert out.shape == (B * T, output_size)
    assert hid.shape == (n_layers, B, hidden_dim)
    assert jnp.allclose(out, out_ref_, atol=2e-5), "f32 fc output mismatch"
    assert jnp.allclose(hid, hidden_ref_, atol=2e-5), "f32 hidden mismatch"

    # --- f32 weights, t_block=3 -> ragged last time block (masked path) -----
    out, hid = rnn_forward_pallas(prepped32, x, hidden0, hidden_dim,
                                  output_size, t_block=3)
    out = jax.block_until_ready(out)
    assert jnp.allclose(out, out_ref_, atol=2e-5), "masked fc output mismatch"
    assert jnp.allclose(hid, hidden_ref_, atol=2e-5), "masked hidden mismatch"

    # --- bf16 weights / streamed activations, f32 carry+tanh (loose tol) ----
    prepped16 = prepare_params(params, hidden_dim, output_size,
                               wt_dtype=jnp.bfloat16)
    out, hid = rnn_forward_pallas(prepped16, x, hidden0, hidden_dim,
                                  output_size, t_block=4)
    out = jax.block_until_ready(out)
    assert jnp.allclose(out, out_ref_, atol=1e-1), "bf16 fc output mismatch"
    assert jnp.allclose(hid, hidden_ref_, atol=1e-1), "bf16 hidden mismatch"

    print("KERNEL_OK")
</pallas_src>

<mosaic_0001>
module attributes {stable_mosaic.version = 11 : i64} {
  func.func @kernel(%arg0: i32, %arg1: i32, %arg2: memref<4x8x16xf32, #tpu.memory_space<vmem>>, %arg3: memref<16x128xf32, #tpu.memory_space<vmem>>, %arg4: memref<1x128x128xf32, #tpu.memory_space<vmem>>, %arg5: memref<2x128x128xf32, #tpu.memory_space<vmem>>, %arg6: memref<2x1x128xf32, #tpu.memory_space<vmem>>, %arg7: memref<2x8x128xf32, #tpu.memory_space<vmem>>, %arg8: memref<128x128xf32, #tpu.memory_space<vmem>>, %arg9: memref<1x128xf32, #tpu.memory_space<vmem>>, %arg10: memref<4x8x128xf32, #tpu.memory_space<vmem>>, %arg11: memref<2x8x128xf32, #tpu.memory_space<vmem>>, %arg12: memref<4x8x128xf32, #tpu.memory_space<vmem>>, %arg13: memref<4x8x128xf32, #tpu.memory_space<vmem>>) attributes {dimension_semantics = [#tpu.dimension_semantics<parallel>, #tpu.dimension_semantics<arbitrary>], iteration_bounds = array<i64: 1, 2>, scalar_prefetch = 0 : i64, scratch_operands = 2 : i64, tpu.core_type = #tpu.core_type<tc>, window_params = [{transform_indices = @transform_0, window_bounds = array<i64: 4, 8, 16>}, {pipeline_mode = #tpu.pipeline_mode<synchronous>, transform_indices = @transform_1, window_bounds = array<i64: 16, 128>}, {pipeline_mode = #tpu.pipeline_mode<synchronous>, transform_indices = @transform_2, window_bounds = array<i64: 1, 128, 128>}, {pipeline_mode = #tpu.pipeline_mode<synchronous>, transform_indices = @transform_3, window_bounds = array<i64: 2, 128, 128>}, {pipeline_mode = #tpu.pipeline_mode<synchronous>, transform_indices = @transform_4, window_bounds = array<i64: 2, 1, 128>}, {transform_indices = @transform_5, window_bounds = array<i64: 2, 8, 128>}, {pipeline_mode = #tpu.pipeline_mode<synchronous>, transform_indices = @transform_6, window_bounds = array<i64: 128, 128>}, {pipeline_mode = #tpu.pipeline_mode<synchronous>, transform_indices = @transform_7, window_bounds = array<i64: 1, 128>}, {transform_indices = @transform_8, window_bounds = array<i64: 4, 8, 128>}, {transform_indices = @transform_9, window_bounds = array<i64: 2, 8, 128>}]} {
    %c0_i32 = arith.constant 0 : i32
    %0 = arith.cmpi eq, %arg1, %c0_i32 : i32
    %1 = arith.extui %0 : i1 to i32
    %c0_i32_0 = arith.constant 0 : i32
    %2 = arith.cmpi ne, %1, %c0_i32_0 : i32
    scf.if %2 {
      %c0_98 = arith.constant 0 : index
      %c0_99 = arith.constant 0 : index
      %c0_100 = arith.constant 0 : index
      %127 = vector.load %arg7[%c0_98, %c0_99, %c0_100] : memref<2x8x128xf32, #tpu.memory_space<vmem>>, vector<2x8x128xf32>
      %c0_101 = arith.constant 0 : index
      %c0_102 = arith.constant 0 : index
      %c0_103 = arith.constant 0 : index
      %128 = vector.load %arg11[%c0_101, %c0_102, %c0_103] : memref<2x8x128xf32, #tpu.memory_space<vmem>>, vector<2x8x128xf32>
      tpu.vector_store %arg11[%c0_101, %c0_102, %c0_103], %127 {strides = array<i32>} : memref<2x8x128xf32, #tpu.memory_space<vmem>>, vector<2x8x128xf32>,
    } else {
    }
    %c0 = arith.constant 0 : index
    %c0_1 = arith.constant 0 : index
    %c0_2 = arith.constant 0 : index
    %3 = vector.load %arg2[%c0, %c0_1, %c0_2] : memref<4x8x16xf32, #tpu.memory_space<vmem>>, vector<4x8x16xf32>
    %c0_3 = arith.constant 0 : index
    %c0_4 = arith.constant 0 : index
    %4 = vector.load %arg3[%c0_3, %c0_4] : memref<16x128xf32, #tpu.memory_space<vmem>>, vector<16x128xf32>
    %5 = vector.shape_cast %3 : vector<4x8x16xf32> to vector<32x16xf32>
    %cst = arith.constant dense<0.000000e+00> : vector<32x128xf32>
    %6 = tpu.matmul %5, %4, %cst {dimension_numbers = #tpu.dot_dimension_numbers<[1], [0], [0], [1], [0, 0, 1, 1], [], []>} : vector<32x16xf32>, vector<16x128xf32>, vector<32x128xf32> -> vector<32x128xf32>
    %c0_5 = arith.constant 0 : index
    %c0_6 = arith.constant 0 : index
    %c0_7 = arith.constant 0 : index
    %7 = vector.load %arg6[%c0_5, %c0_6, %c0_7] : memref<2x1x128xf32, #tpu.memory_space<vmem>>, vector<1x1x128xf32>
    %8 = vector.shape_cast %7 : vector<1x1x128xf32> to vector<1x128xf32>
    %9 = vector.broadcast %8 : vector<1x128xf32> to vector<32x128xf32>
    %10 = arith.addf %6, %9 : vector<32x128xf32>
    %11 = vector.shape_cast %10 : vector<32x128xf32> to vector<4x8x128xf32>
    %c0_8 = arith.constant 0 : index
    %c0_9 = arith.constant 0 : index
    %c0_10 = arith.constant 0 : index
    %12 = vector.load %arg12[%c0_8, %c0_9, %c0_10] : memref<4x8x128xf32, #tpu.memory_space<vmem>>, vector<4x8x128xf32>
    tpu.vector_store %arg12[%c0_8, %c0_9, %c0_10], %11 {strides = array<i32>} : memref<4x8x128xf32, #tpu.memory_space<vmem>>, vector<4x8x128xf32>,
    %c0_11 = arith.constant 0 : index
    %c0_12 = arith.constant 0 : index
    %c0_13 = arith.constant 0 : index
    %13 = vector.load %arg5[%c0_11, %c0_12, %c0_13] : memref<2x128x128xf32, #tpu.memory_space<vmem>>, vector<1x128x128xf32>
    %14 = vector.shape_cast %13 : vector<1x128x128xf32> to vector<128x128xf32>
    %c0_14 = arith.constant 0 : index
    %c0_15 = arith.constant 0 : index
    %c0_16 = arith.constant 0 : index
    %15 = vector.load %arg11[%c0_14, %c0_15, %c0_16] : memref<2x8x128xf32, #tpu.memory_space<vmem>>, vector<1x8x128xf32>
    %16 = vector.shape_cast %15 : vector<1x8x128xf32> to vector<8x128xf32>
    %c0_i32_17 = arith.constant 0 : i32
    %cst_18 = arith.constant dense<0.000000e+00> : vector<8x128xf32>
    %17 = tpu.matmul %16, %14, %cst_18 {dimension_numbers = #tpu.dot_dimension_numbers<[1], [0], [0], [1], [0, 0, 1, 1], [], []>} : vector<8x128xf32>, vector<128x128xf32>, vector<8x128xf32> -> vector<8x128xf32>
    %18 = arith.index_cast %c0_i32_17 : i32 to index
    %c0_19 = arith.constant 0 : index
    %c0_20 = arith.constant 0 : index
    %19 = vector.load %arg12[%18, %c0_19, %c0_20] : memref<4x8x128xf32, #tpu.memory_space<vmem>>, vector<1x8x128xf32>
    %20 = vector.shape_cast %19 : vector<1x8x128xf32> to vector<8x128xf32>
    %21 = arith.addf %17, %20 : vector<8x128xf32>
    %22 = math.tanh %21 : vector<8x128xf32>
    %23 = arith.index_cast %c0_i32_17 : i32 to index
    %c0_21 = arith.constant 0 : index
    %c0_22 = arith.constant 0 : index
    %24 = vector.load %arg12[%23, %c0_21, %c0_22] : memref<4x8x128xf32, #tpu.memory_space<vmem>>, vector<1x8x128xf32>
    %25 = vector.shape_cast %24 : vector<1x8x128xf32> to vector<8x128xf32>
    %26 = vector.shape_cast %22 : vector<8x128xf32> to vector<1x8x128xf32>
    tpu.vector_store %arg12[%23, %c0_21, %c0_22], %26 {strides = array<i32>} : memref<4x8x128xf32, #tpu.memory_space<vmem>>, vector<1x8x128xf32>,
    %c1_i32 = arith.constant 1 : i32
    %cst_23 = arith.constant dense<0.000000e+00> : vector<8x128xf32>
    %27 = tpu.matmul %22, %14, %cst_23 {dimension_numbers = #tpu.dot_dimension_numbers<[1], [0], [0], [1], [0, 0, 1, 1], [], []>} : vector<8x128xf32>, vector<128x128xf32>, vector<8x128xf32> -> vector<8x128xf32>
    %28 = arith.index_cast %c1_i32 : i32 to index
    %c0_24 = arith.constant 0 : index
    %c0_25 = arith.constant 0 : index
    %29 = vector.load %arg12[%28, %c0_24, %c0_25] : memref<4x8x128xf32, #tpu.memory_space<vmem>>, vector<1x8x128xf32>
    %30 = vector.shape_cast %29 : vector<1x8x128xf32> to vector<8x128xf32>
    %31 = arith.addf %27, %30 : vector<8x128xf32>
    %32 = math.tanh %31 : vector<8x128xf32>
    %33 = arith.index_cast %c1_i32 : i32 to index
    %c0_26 = arith.constant 0 : index
    %c0_27 = arith.constant 0 : index
    %34 = vector.load %arg12[%33, %c0_26, %c0_27] : memref<4x8x128xf32, #tpu.memory_space<vmem>>, vector<1x8x128xf32>
    %35 = vector.shape_cast %34 : vector<1x8x128xf32> to vector<8x128xf32>
    %36 = vector.shape_cast %32 : vector<8x128xf32> to vector<1x8x128xf32>
    tpu.vector_store %arg12[%33, %c0_26, %c0_27], %36 {strides = array<i32>} : memref<4x8x128xf32, #tpu.memory_space<vmem>>, vector<1x8x128xf32>,
    %c2_i32 = arith.constant 2 : i32
    %cst_28 = arith.constant dense<0.000000e+00> : vector<8x128xf32>
    %37 = tpu.matmul %32, %14, %cst_28 {dimension_numbers = #tpu.dot_dimension_numbers<[1], [0], [0], [1], [0, 0, 1, 1], [], []>} : vector<8x128xf32>, vector<128x128xf32>, vector<8x128xf32> -> vector<8x128xf32>
    %38 = arith.index_cast %c2_i32 : i32 to index
    %c0_29 = arith.constant 0 : index
    %c0_30 = arith.constant 0 : index
    %39 = vector.load %arg12[%38, %c0_29, %c0_30] : memref<4x8x128xf32, #tpu.memory_space<vmem>>, vector<1x8x128xf32>
    %40 = vector.shape_cast %39 : vector<1x8x128xf32> to vector<8x128xf32>
    %41 = arith.addf %37, %40 : vector<8x128xf32>
    %42 = math.tanh %41 : vector<8x128xf32>
    %43 = arith.index_cast %c2_i32 : i32 to index
    %c0_31 = arith.constant 0 : index
    %c0_32 = arith.constant 0 : index
    %44 = vector.load %arg12[%43, %c0_31, %c0_32] : memref<4x8x128xf32, #tpu.memory_space<vmem>>, vector<1x8x128xf32>
    %45 = vector.shape_cast %44 : vector<1x8x128xf32> to vector<8x128xf32>
    %46 = vector.shape_cast %42 : vector<8x128xf32> to vector<1x8x128xf32>
    tpu.vector_store %arg12[%43, %c0_31, %c0_32], %46 {strides = array<i32>} : memref<4x8x128xf32, #tpu.memory_space<vmem>>, vector<1x8x128xf32>,
    %c3_i32 = arith.constant 3 : i32
    %cst_33 = arith.constant dense<0.000000e+00> : vector<8x128xf32>
    %47 = tpu.matmul %42, %14, %cst_33 {dimension_numbers = #tpu.dot_dimension_numbers<[1], [0], [0], [1], [0, 0, 1, 1], [], []>} : vector<8x128xf32>, vector<128x128xf32>, vector<8x128xf32> -> vector<8x128xf32>
    %48 = arith.index_cast %c3_i32 : i32 to index
    %c0_34 = arith.constant 0 : index
    %c0_35 = arith.constant 0 : index
    %49 = vector.load %arg12[%48, %c0_34, %c0_35] : memref<4x8x128xf32, #tpu.memory_space<vmem>>, vector<1x8x128xf32>
    %50 = vector.shape_cast %49 : vector<1x8x128xf32> to vector<8x128xf32>
    %51 = arith.addf %47, %50 : vector<8x128xf32>
    %52 = math.tanh %51 : vector<8x128xf32>
    %53 = arith.index_cast %c3_i32 : i32 to index
    %c0_36 = arith.constant 0 : index
    %c0_37 = arith.constant 0 : index
    %54 = vector.load %arg12[%53, %c0_36, %c0_37] : memref<4x8x128xf32, #tpu.memory_space<vmem>>, vector<1x8x128xf32>
    %55 = vector.shape_cast %54 : vector<1x8x128xf32> to vector<8x128xf32>
    %56 = vector.shape_cast %52 : vector<8x128xf32> to vector<1x8x128xf32>
    tpu.vector_store %arg12[%53, %c0_36, %c0_37], %56 {strides = array<i32>} : memref<4x8x128xf32, #tpu.memory_space<vmem>>, vector<1x8x128xf32>,
    %c4_i32 = arith.constant 4 : i32
    %c0_38 = arith.constant 0 : index
    %c0_39 = arith.constant 0 : index
    %c0_40 = arith.constant 0 : index
    %57 = vector.load %arg11[%c0_38, %c0_39, %c0_40] : memref<2x8x128xf32, #tpu.memory_space<vmem>>, vector<1x8x128xf32>
    %58 = vector.shape_cast %57 : vector<1x8x128xf32> to vector<8x128xf32>
    %59 = vector.shape_cast %52 : vector<8x128xf32> to vector<1x8x128xf32>
    tpu.vector_store %arg11[%c0_38, %c0_39, %c0_40], %59 {strides = array<i32>} : memref<2x8x128xf32, #tpu.memory_space<vmem>>, vector<1x8x128xf32>,
    %c0_41 = arith.constant 0 : index
    %c0_42 = arith.constant 0 : index
    %c0_43 = arith.constant 0 : index
    %60 = vector.load %arg12[%c0_41, %c0_42, %c0_43] : memref<4x8x128xf32, #tpu.memory_space<vmem>>, vector<4x8x128xf32>
    %c0_44 = arith.constant 0 : index
    %c0_45 = arith.constant 0 : index
    %c0_46 = arith.constant 0 : index
    %61 = vector.load %arg4[%c0_44, %c0_45, %c0_46] : memref<1x128x128xf32, #tpu.memory_space<vmem>>, vector<1x128x128xf32>
    %62 = vector.shape_cast %61 : vector<1x128x128xf32> to vector<128x128xf32>
    %63 = vector.shape_cast %60 : vector<4x8x128xf32> to vector<32x128xf32>
    %cst_47 = arith.constant dense<0.000000e+00> : vector<32x128xf32>
    %64 = tpu.matmul %63, %62, %cst_47 {dimension_numbers = #tpu.dot_dimension_numbers<[1], [0], [0], [1], [0, 0, 1, 1], [], []>} : vector<32x128xf32>, vector<128x128xf32>, vector<32x128xf32> -> vector<32x128xf32>
    %c1 = arith.constant 1 : index
    %c0_48 = arith.constant 0 : index
    %c0_49 = arith.constant 0 : index
    %65 = vector.load %arg6[%c1, %c0_48, %c0_49] : memref<2x1x128xf32, #tpu.memory_space<vmem>>, vector<1x1x128xf32>
    %66 = vector.shape_cast %65 : vector<1x1x128xf32> to vector<1x128xf32>
    %67 = vector.broadcast %66 : vector<1x128xf32> to vector<32x128xf32>
    %68 = arith.addf %64, %67 : vector<32x128xf32>
    %69 = vector.shape_cast %68 : vector<32x128xf32> to vector<4x8x128xf32>
    %c0_50 = arith.constant 0 : index
    %c0_51 = arith.constant 0 : index
    %c0_52 = arith.constant 0 : index
    %70 = vector.load %arg13[%c0_50, %c0_51, %c0_52] : memref<4x8x128xf32, #tpu.memory_space<vmem>>, vector<4x8x128xf32>
    tpu.vector_store %arg13[%c0_50, %c0_51, %c0_52], %69 {strides = array<i32>} : memref<4x8x128xf32, #tpu.memory_space<vmem>>, vector<4x8x128xf32>,
    %c1_53 = arith.constant 1 : index
    %c0_54 = arith.constant 0 : index
    %c0_55 = arith.constant 0 : index
    %71 = vector.load %arg5[%c1_53, %c0_54, %c0_55] : memref<2x128x128xf32, #tpu.memory_space<vmem>>, vector<1x128x128xf32>
    %72 = vector.shape_cast %71 : vector<1x128x128xf32> to vector<128x128xf32>
    %c1_56 = arith.constant 1 : index
    %c0_57 = arith.constant 0 : index
    %c0_58 = arith.constant 0 : index
    %73 = vector.load %arg11[%c1_56, %c0_57, %c0_58] : memref<2x8x128xf32, #tpu.memory_space<vmem>>, vector<1x8x128xf32>
    %74 = vector.shape_cast %73 : vector<1x8x128xf32> to vector<8x128xf32>
    %c0_i32_59 = arith.constant 0 : i32
    %cst_60 = arith.constant dense<0.000000e+00> : vector<8x128xf32>
    %75 = tpu.matmul %74, %72, %cst_60 {dimension_numbers = #tpu.dot_dimension_numbers<[1], [0], [0], [1], [0, 0, 1, 1], [], []>} : vector<8x128xf32>, vector<128x128xf32>, vector<8x128xf32> -> vector<8x128xf32>
    %76 = arith.index_cast %c0_i32_59 : i32 to index
    %c0_61 = arith.constant 0 : index
    %c0_62 = arith.constant 0 : index
    %77 = vector.load %arg13[%76, %c0_61, %c0_62] : memref<4x8x128xf32, #tpu.memory_space<vmem>>, vector<1x8x128xf32>
    %78 = vector.shape_cast %77 : vector<1x8x128xf32> to vector<8x128xf32>
    %79 = arith.addf %75, %78 : vector<8x128xf32>
    %80 = math.tanh %79 : vector<8x128xf32>
    %81 = arith.index_cast %c0_i32_59 : i32 to index
    %c0_63 = arith.constant 0 : index
    %c0_64 = arith.constant 0 : index
    %82 = vector.load %arg13[%81, %c0_63, %c0_64] : memref<4x8x128xf32, #tpu.memory_space<vmem>>, vector<1x8x128xf32>
    %83 = vector.shape_cast %82 : vector<1x8x128xf32> to vector<8x128xf32>
    %84 = vector.shape_cast %80 : vector<8x128xf32> to vector<1x8x128xf32>
    tpu.vector_store %arg13[%81, %c0_63, %c0_64], %84 {strides = array<i32>} : memref<4x8x128xf32, #tpu.memory_space<vmem>>, vector<1x8x128xf32>,
    %c1_i32_65 = arith.constant 1 : i32
    %cst_66 = arith.constant dense<0.000000e+00> : vector<8x128xf32>
    %85 = tpu.matmul %80, %72, %cst_66 {dimension_numbers = #tpu.dot_dimension_numbers<[1], [0], [0], [1], [0, 0, 1, 1], [], []>} : vector<8x128xf32>, vector<128x128xf32>, vector<8x128xf32> -> vector<8x128xf32>
    %86 = arith.index_cast %c1_i32_65 : i32 to index
    %c0_67 = arith.constant 0 : index
    %c0_68 = arith.constant 0 : index
    %87 = vector.load %arg13[%86, %c0_67, %c0_68] : memref<4x8x128xf32, #tpu.memory_space<vmem>>, vector<1x8x128xf32>
    %88 = vector.shape_cast %87 : vector<1x8x128xf32> to vector<8x128xf32>
    %89 = arith.addf %85, %88 : vector<8x128xf32>
    %90 = math.tanh %89 : vector<8x128xf32>
    %91 = arith.index_cast %c1_i32_65 : i32 to index
    %c0_69 = arith.constant 0 : index
    %c0_70 = arith.constant 0 : index
    %92 = vector.load %arg13[%91, %c0_69, %c0_70] : memref<4x8x128xf32, #tpu.memory_space<vmem>>, vector<1x8x128xf32>
    %93 = vector.shape_cast %92 : vector<1x8x128xf32> to vector<8x128xf32>
    %94 = vector.shape_cast %90 : vector<8x128xf32> to vector<1x8x128xf32>
    tpu.vector_store %arg13[%91, %c0_69, %c0_70], %94 {strides = array<i32>} : memref<4x8x128xf32, #tpu.memory_space<vmem>>, vector<1x8x128xf32>,
    %c2_i32_71 = arith.constant 2 : i32
    %cst_72 = arith.constant dense<0.000000e+00> : vector<8x128xf32>
    %95 = tpu.matmul %90, %72, %cst_72 {dimension_numbers = #tpu.dot_dimension_numbers<[1], [0], [0], [1], [0, 0, 1, 1], [], []>} : vector<8x128xf32>, vector<128x128xf32>, vector<8x128xf32> -> vector<8x128xf32>
    %96 = arith.index_cast %c2_i32_71 : i32 to index
    %c0_73 = arith.constant 0 : index
    %c0_74 = arith.constant 0 : index
    %97 = vector.load %arg13[%96, %c0_73, %c0_74] : memref<4x8x128xf32, #tpu.memory_space<vmem>>, vector<1x8x128xf32>
    %98 = vector.shape_cast %97 : vector<1x8x128xf32> to vector<8x128xf32>
    %99 = arith.addf %95, %98 : vector<8x128xf32>
    %100 = math.tanh %99 : vector<8x128xf32>
    %101 = arith.index_cast %c2_i32_71 : i32 to index
    %c0_75 = arith.constant 0 : index
    %c0_76 = arith.constant 0 : index
    %102 = vector.load %arg13[%101, %c0_75, %c0_76] : memref<4x8x128xf32, #tpu.memory_space<vmem>>, vector<1x8x128xf32>
    %103 = vector.shape_cast %102 : vector<1x8x128xf32> to vector<8x128xf32>
    %104 = vector.shape_cast %100 : vector<8x128xf32> to vector<1x8x128xf32>
    tpu.vector_store %arg13[%101, %c0_75, %c0_76], %104 {strides = array<i32>} : memref<4x8x128xf32, #tpu.memory_space<vmem>>, vector<1x8x128xf32>,
    %c3_i32_77 = arith.constant 3 : i32
    %cst_78 = arith.constant dense<0.000000e+00> : vector<8x128xf32>
    %105 = tpu.matmul %100, %72, %cst_78 {dimension_numbers = #tpu.dot_dimension_numbers<[1], [0], [0], [1], [0, 0, 1, 1], [], []>} : vector<8x128xf32>, vector<128x128xf32>, vector<8x128xf32> -> vector<8x128xf32>
    %106 = arith.index_cast %c3_i32_77 : i32 to index
    %c0_79 = arith.constant 0 : index
    %c0_80 = arith.constant 0 : index
    %107 = vector.load %arg13[%106, %c0_79, %c0_80] : memref<4x8x128xf32, #tpu.memory_space<vmem>>, vector<1x8x128xf32>
    %108 = vector.shape_cast %107 : vector<1x8x128xf32> to vector<8x128xf32>
    %109 = arith.addf %105, %108 : vector<8x128xf32>
    %110 = math.tanh %109 : vector<8x128xf32>
    %111 = arith.index_cast %c3_i32_77 : i32 to index
    %c0_81 = arith.constant 0 : index
    %c0_82 = arith.constant 0 : index
    %112 = vector.load %arg13[%111, %c0_81, %c0_82] : memref<4x8x128xf32, #tpu.memory_space<vmem>>, vector<1x8x128xf32>
    %113 = vector.shape_cast %112 : vector<1x8x128xf32> to vector<8x128xf32>
    %114 = vector.shape_cast %110 : vector<8x128xf32> to vector<1x8x128xf32>
    tpu.vector_store %arg13[%111, %c0_81, %c0_82], %114 {strides = array<i32>} : memref<4x8x128xf32, #tpu.memory_space<vmem>>, vector<1x8x128xf32>,
    %c4_i32_83 = arith.constant 4 : i32
    %c1_84 = arith.constant 1 : index
    %c0_85 = arith.constant 0 : index
    %c0_86 = arith.constant 0 : index
    %115 = vector.load %arg11[%c1_84, %c0_85, %c0_86] : memref<2x8x128xf32, #tpu.memory_space<vmem>>, vector<1x8x128xf32>
    %116 = vector.shape_cast %115 : vector<1x8x128xf32> to vector<8x128xf32>
    %117 = vector.shape_cast %110 : vector<8x128xf32> to vector<1x8x128xf32>
    tpu.vector_store %arg11[%c1_84, %c0_85, %c0_86], %117 {strides = array<i32>} : memref<2x8x128xf32, #tpu.memory_space<vmem>>, vector<1x8x128xf32>,
    %c0_87 = arith.constant 0 : index
    %c0_88 = arith.constant 0 : index
    %c0_89 = arith.constant 0 : index
    %118 = vector.load %arg13[%c0_87, %c0_88, %c0_89] : memref<4x8x128xf32, #tpu.memory_space<vmem>>, vector<4x8x128xf32>
    %119 = vector.shape_cast %118 : vector<4x8x128xf32> to vector<32x128xf32>
    %c0_90 = arith.constant 0 : index
    %c0_91 = arith.constant 0 : index
    %120 = vector.load %arg8[%c0_90, %c0_91] : memref<128x128xf32, #tpu.memory_space<vmem>>, vector<128x128xf32>
    %cst_92 = arith.constant dense<0.000000e+00> : vector<32x128xf32>
    %121 = tpu.matmul %119, %120, %cst_92 {dimension_numbers = #tpu.dot_dimension_numbers<[1], [0], [0], [1], [0, 0, 1, 1], [], []>} : vector<32x128xf32>, vector<128x128xf32>, vector<32x128xf32> -> vector<32x128xf32>
    %c0_93 = arith.constant 0 : index
    %c0_94 = arith.constant 0 : index
    %122 = vector.load %arg9[%c0_93, %c0_94] : memref<1x128xf32, #tpu.memory_space<vmem>>, vector<1x128xf32>
    %123 = vector.broadcast %122 : vector<1x128xf32> to vector<32x128xf32>
    %124 = arith.addf %121, %123 : vector<32x128xf32>
    %125 = vector.shape_cast %124 : vector<32x128xf32> to vector<4x8x128xf32>
    %c0_95 = arith.constant 0 : index
    %c0_96 = arith.constant 0 : index
    %c0_97 = arith.constant 0 : index
    %126 = vector.load %arg10[%c0_95, %c0_96, %c0_97] : memref<4x8x128xf32, #tpu.memory_space<vmem>>, vector<4x8x128xf32>
    tpu.vector_store %arg10[%c0_95, %c0_96, %c0_97], %125 {strides = array<i32>} : memref<4x8x128xf32, #tpu.memory_space<vmem>>, vector<4x8x128xf32>,
    return
  }
  func.func @transform_0(%arg0: i32, %arg1: i32) -> (i32, i32, i32) {
    %c0_i32 = arith.constant 0 : i32
    %c0_i32_0 = arith.constant 0 : i32
    return %arg1, %arg0, %c0_i32 : i32, i32, i32
  }
  func.func @transform_1(%arg0: i32, %arg1: i32) -> (i32, i32) {
    %c0_i32 = arith.constant 0 : i32
    %c0_i32_0 = arith.constant 0 : i32
    %c0_i32_1 = arith.constant 0 : i32
    return %c0_i32, %c0_i32_0 : i32, i32
  }
  func.func @transform_2(%arg0: i32, %arg1: i32) -> (i32, i32, i32) {
    %c0_i32 = arith.constant 0 : i32
    %c0_i32_0 = arith.constant 0 : i32
    %c0_i32_1 = arith.constant 0 : i32
    %c0_i32_2 = arith.constant 0 : i32
    return %c0_i32, %c0_i32_0, %c0_i32_1 : i32, i32, i32
  }
  func.func @transform_3(%arg0: i32, %arg1: i32) -> (i32, i32, i32) {
    %c0_i32 = arith.constant 0 : i32
    %c0_i32_0 = arith.constant 0 : i32
    %c0_i32_1 = arith.constant 0 : i32
    %c0_i32_2 = arith.constant 0 : i32
    return %c0_i32, %c0_i32_0, %c0_i32_1 : i32, i32, i32
  }
  func.func @transform_4(%arg0: i32, %arg1: i32) -> (i32, i32, i32) {
    %c0_i32 = arith.constant 0 : i32
    %c0_i32_0 = arith.constant 0 : i32
    %c0_i32_1 = arith.constant 0 : i32
    %c0_i32_2 = arith.constant 0 : i32
    return %c0_i32, %c0_i32_0, %c0_i32_1 : i32, i32, i32
  }
  func.func @transform_5(%arg0: i32, %arg1: i32) -> (i32, i32, i32) {
    %c0_i32 = arith.constant 0 : i32
    %c0_i32_0 = arith.constant 0 : i32
    %c0_i32_1 = arith.constant 0 : i32
    return %c0_i32, %arg0, %c0_i32_0 : i32, i32, i32
  }
  func.func @transform_6(%arg0: i32, %arg1: i32) -> (i32, i32) {
    %c0_i32 = arith.constant 0 : i32
    %c0_i32_0 = arith.constant 0 : i32
    %c0_i32_1 = arith.constant 0 : i32
    return %c0_i32, %c0_i32_0 : i32, i32
  }
  func.func @transform_7(%arg0: i32, %arg1: i32) -> (i32, i32) {
    %c0_i32 = arith.constant 0 : i32
    %c0_i32_0 = arith.constant 0 : i32
    %c0_i32_1 = arith.constant 0 : i32
    return %c0_i32, %c0_i32_0 : i32, i32
  }
  func.func @transform_8(%arg0: i32, %arg1: i32) -> (i32, i32, i32) {
    %c0_i32 = arith.constant 0 : i32
    %c0_i32_0 = arith.constant 0 : i32
    return %arg1, %arg0, %c0_i32 : i32, i32, i32
  }
  func.func @transform_9(%arg0: i32, %arg1: i32) -> (i32, i32, i32) {
    %c0_i32 = arith.constant 0 : i32
    %c0_i32_0 = arith.constant 0 : i32
    %c0_i32_1 = arith.constant 0 : i32
    return %c0_i32, %arg0, %c0_i32_0 : i32, i32, i32
  }
}

</mosaic_0001>

<bundles_post_ra>
// kernel: tpu_custom_call.1
= control target key start
LH: loop header
LB: loop body
LE: loop exit
PB: predicated region body
PF: predicated region fallthrough
CT: control target
= control target key end

     0   :  { %s3473_s0 = inlined_call_operand.hbm [shape: f32[8,8,16], index: 0, kind: input, shape index: {}]   ;;  %s3474_s1 = inlined_call_operand.hbm [shape: f32[16,128], index: 1, kind: input, shape index: {}]   ;;  %s3475_s2 = inlined_call_operand.hbm [shape: f32[1,128,128], index: 2, kind: input, shape index: {}]   ;;  %s3476_s3 = inlined_call_operand.hbm [shape: f32[2,128,128], index: 3, kind: input, shape index: {}]   ;;  %s3477_s4 = inlined_call_operand.vmem [shape: f32[2,1,128], index: 4, kind: input, shape index: {}]   ;;  %s3478_s5 = inlined_call_operand.vmem [shape: f32[2,8,128], index: 5, kind: input, shape index: {}]   ;;  %s3479_s6 = inlined_call_operand.hbm [shape: f32[128,128], index: 6, kind: input, shape index: {}]   ;;  %s3480_s7 = inlined_call_operand.vmem [shape: f32[1,128], index: 7, kind: input, shape index: {}]   ;;  %s3481_s8 = inlined_call_operand.hbm [shape: f32[8,8,128], index: 8, kind: output, shape index: {0}]   ;;  %s3482_s9 = inlined_call_operand.hbm [shape: f32[2,8,128], index: 9, kind: output, shape index: {1}]  }
   0x1   :  { %3493 = sst [smem:[#allocation23_spill]] %s3477_s4 }
   0x2   :  { %3494 = sst [smem:[#allocation24_spill]] %s3480_s7 }
   0x3   :  { %3495 = sst [smem:[#allocation25_spill]] %s3481_s8 }
   0x4   :  { %3496 = sst [smem:[#allocation26_spill]] %s3482_s9 }
   0x5   :  { %15 = vsyncpa [#allocation5], 0 }
   0x6   :  { %17 = vsyncpa [#allocation5 + $0x1], 0 }
   0x7   :  { %18 = vsyncpa [#allocation8], 0 }
   0x8   :  { %19 = vsyncpa [#allocation11], 0 }
   0x9   :  { %20 = vsyncpa [#allocation6], 0 }
   0xa   :  { %22 = vsyncpa [#allocation6 + $0x1], 0 }
   0xb   :  { %23 = vsyncpa [#allocation15], 0  ;;  %s2920_s30 = smov 0   ;;  %s2922_s10 = smov 0  }
   0xc   :  { %s2924_s11 = smov 0   ;;  %s2926_s12 = smov 0  }
   0xd   :  { %s2928_s13 = smov 0   ;;  %s2930_s14 = smov 0  }
   0xe LB: > { %3497 = sst [smem:[#allocation21_spill]] %s2834_s30  ;;  %s1614_s15 = sadd.s32 4294967295, %s2854_s14   ;;  %s2854_s14 = sphi %s2930_s14, %s29_s14   ;;  %s2850_s13 = sphi %s2928_s13, %s3526_s13   ;;  %s2846_s12 = sphi %s2926_s12, %s3525_s12   ;;  %s2842_s11 = sphi %s2924_s11, %s3524_s11   ;;  %s2838_s10 = sphi %s2922_s10, %s3523_s10   ;;  %s2834_s30 = sphi %s2920_s30, %s3522_s30  }
   0xf   : > { %s1615_s16 = sadd.s32 4294967294, %s2854_s14   ;;  %p63_p0 = scmp.ne.s32.totalorder %s2838_s10, %s2834_s30 }
  0x10   : > { %p2954_p1 = scmp.eq.s32.totalorder %s1614_s15, 0  ;;  %p2958_p2 = scmp.eq.s32.totalorder %s1614_s15, 1 }
  0x11   : > { %p247_p3 = scmp.eq.s32.totalorder %s1615_s16, 1  ;;  %p1616_p5 = scmp.ge.s32.totalorder %s2854_s14, 1 }
  0x12   : > { %s3498_s17 = scalar_select %p2954_p1, 1, 0 }
  0x13   : > { %s3499_s18 = scalar_select %p2958_p2, 1, 0 }
  0x14   : > { %p2964_p4 = por %p2954_p1, %p63_p0  ;;  %p2969_p6 = por %p247_p3, %p63_p0 }
  0x15   : > { %p280_p7 = scmp.lt.s32.totalorder %s2854_s14, 3  ;;  %s2856_s22 = smov [#allocation7]  }
  0x16   : > { %s3500_s19 = scalar_select %p2964_p4, 1, 0 }
  0x17   : > { %s3501_s20 = scalar_select %p2969_p6, 1, 0 }
  0x18   : > { %p2974_p8 = pnand %p1616_p5, %p280_p7  ;;  %s292_s23 = sshll.u32 %s2856_s22, 4  ;;  %s2978_s23 = int_to_ptr.vmem [resolvable:$true] %s292_s23 }
  0x19   : > { %3502 = sst [smem:[#allocation22_spill]] %s3501_s20  ;;  %s2857_s25 = smov [#allocation10]  }
  0x1a   : > { %s3503_s21 = scalar_select %p2974_p8, 1, 0 }
  0x1b   : > { %p2483_p9 = pneg %p2974_p8  ;;  %s318_s26 = sshll.u32 %s2857_s25, 4  ;;  %s2989_s26 = int_to_ptr.vmem [resolvable:$true] %s318_s26 }
  0x1c   : > { %s2858_s27 = smov [#allocation9]   ;;  %s2592_s16 = scalar_lea.hbm %s3474_s1, 256 }
  0x1d   : > { %p2985_p11 = pnand %p2483_p9, %p2954_p1  ;;  %s2991_s28 = sshll.u32 %s2858_s27, 4  ;;  %s306_s28 = int_to_ptr.vmem [resolvable:$true] %s2991_s28 }
  0x1e   : > { %p2593_p12 = scmp.ne.s32.totalorder %s3474_s1, %s2592_s16  ;;  %p2599_p5 = scmp.lt.u32.totalorder %s2592_s16, %s3474_s1 }
  0x1f   : > { %p3001_p13 = pneg %p2985_p11 }
  0x21   : > { %p2595_p0 = pnand %p3001_p13, %p2593_p12 }
  0x23   : > { %p2596_p3 = pneg %p2595_p0 }
  0x25   : > { %p2601_p7 = pnand %p2599_p5, %p2596_p3 }
  0x27   : > { %2604 = shalt.err (!%p2601_p7)
}
  0x28   : > { %s2605_s20 = scalar_lea.vmem %s2978_s23, 256  ;;  %p2613_p1 = scmp.lt.s32.totalorder %s2978_s23, %s2978_s23 }
  0x29   : > { %p2606_p9 = scmp.ne.s32.totalorder %s2978_s23, %s2605_s20  ;;  %p2614_p4 = scmp.lt.s32.totalorder %s2605_s20, %s2605_s20 }
  0x2b   : > { %p2608_p10 = pnand %p2606_p9, %p3001_p13  ;;  %p2615_p12 = por %p2614_p4, %p2613_p1 }
  0x2d   : > { %p2609_p6 = pneg %p2608_p10 }
  0x2f   : > { %p2616_p0 = pnand %p2615_p12, %p2609_p6 }
  0x31   : > { %2619 = shalt.err (!%p2616_p0)
}
  0x32   : > { %s2859_s29 = smov 128   ;;  %s2860_s15 = smov 8  }
  0x33   : > { %2486 = dma.hbm_to_vmem [thread:$0]  (!%p2985_p11), %s3474_s1, 256, %s2978_s23, [#allocation8], %s2859_s29, %s2859_s29, %s2860_s15  }
  0x34   : > { %s2620_s20 = scalar_lea.hbm %s3476_s3, 4096 }
  0x35   : > { %p2621_p1 = scmp.ne.s32.totalorder %s3476_s3, %s2620_s20  ;;  %p2627_p10 = scmp.lt.u32.totalorder %s2620_s20, %s3476_s3 }
  0x37   : > { %p2623_p4 = pnand %p2621_p1, %p3001_p13 }
  0x39   : > { %p2624_p6 = pneg %p2623_p4 }
  0x3b   : > { %p2629_p3 = pnand %p2627_p10, %p2624_p6 }
  0x3d   : > { %2632 = shalt.err (!%p2629_p3)
}
  0x3e   : > { %s2633_s23 = scalar_lea.vmem %s2989_s26, 4096  ;;  %p2641_p12 = scmp.lt.s32.totalorder %s2989_s26, %s2989_s26 }
  0x3f   : > { %p2634_p5 = scmp.ne.s32.totalorder %s2989_s26, %s2633_s23  ;;  %p2642_p0 = scmp.lt.s32.totalorder %s2633_s23, %s2633_s23 }
  0x41   : > { %p2636_p7 = pnand %p2634_p5, %p3001_p13  ;;  %p2643_p1 = por %p2642_p0, %p2641_p12 }
  0x43   : > { %p2637_p9 = pneg %p2636_p7 }
  0x45   : > { %p2644_p4 = pnand %p2643_p1, %p2637_p9 }
  0x47   : > { %2647 = shalt.err (!%p2644_p4)
}
  0x48   : > { %2492 = dma.hbm_to_vmem [thread:$0]  (!%p2985_p11), %s3476_s3, 4096, %s2989_s26, [#allocation11], %s2859_s29, %s2859_s29, %s2860_s15  }
  0x49   : > { %s2648_s16 = scalar_lea.hbm %s3475_s2, 2048 }
  0x4a   : > { %p2649_p6 = scmp.ne.s32.totalorder %s3475_s2, %s2648_s16  ;;  %p2655_p5 = scmp.lt.u32.totalorder %s2648_s16, %s3475_s2 }
  0x4c   : > { %p2651_p10 = pnand %p2649_p6, %p3001_p13 }
  0x4e   : > { %p2652_p3 = pneg %p2651_p10 }
  0x50   : > { %p2657_p7 = pnand %p2655_p5, %p2652_p3 }
  0x52   : > { %2660 = shalt.err (!%p2657_p7)
}
  0x53   : > { %s2661_s23 = scalar_lea.vmem %s306_s28, 2048  ;;  %p2669_p1 = scmp.lt.s32.totalorder %s306_s28, %s306_s28 }
  0x54   : > { %p2662_p9 = scmp.ne.s32.totalorder %s306_s28, %s2661_s23  ;;  %p2670_p4 = scmp.lt.s32.totalorder %s2661_s23, %s2661_s23 }
  0x56   : > { %p2664_p12 = pnand %p2662_p9, %p3001_p13  ;;  %p2671_p8 = por %p2670_p4, %p2669_p1 }
  0x58   : > { %p2665_p0 = pneg %p2664_p12 }
  0x5a   : > { %p2672_p2 = pnand %p2671_p8, %p2665_p0 }
  0x5c   : > { %2675 = shalt.err (!%p2672_p2)
}
  0x5d   : > { %2489 = dma.hbm_to_vmem [thread:$0]  (!%p2985_p11), %s3475_s2, 2048, %s306_s28, [#allocation8], %s2859_s29, %s2859_s29, %s2860_s15  }
  0x5e   : > { %s2861_s7 = smov [#allocation12]   ;;  %s2676_s22 = scalar_lea.hbm %s3479_s6, 2048 }
  0x5f   : > { %s341_s8 = sshll.u32 %s2861_s7, 4  ;;  %p2677_p2 = scmp.ne.s32.totalorder %s3479_s6, %s2676_s22  ;;  %s342_s8 = int_to_ptr.vmem [resolvable:$true] %s341_s8 }
  0x60   : > { %p2683_p10 = scmp.lt.u32.totalorder %s2676_s22, %s3479_s6 }
  0x61   : > { %p2679_p8 = pnand %p2677_p2, %p3001_p13 }
  0x63   : > { %p2680_p6 = pneg %p2679_p8 }
  0x65   : > { %p2685_p3 = pnand %p2683_p10, %p2680_p6 }
  0x67   : > { %2688 = shalt.err (!%p2685_p3)
}
  0x68   : > { %s2689_s28 = scalar_lea.vmem %s342_s8, 2048  ;;  %p2697_p12 = scmp.lt.s32.totalorder %s342_s8, %s342_s8 }
  0x69   : > { %p2690_p5 = scmp.ne.s32.totalorder %s342_s8, %s2689_s28  ;;  %p2698_p0 = scmp.lt.s32.totalorder %s2689_s28, %s2689_s28 }
  0x6b   : > { %p2692_p7 = pnand %p2690_p5, %p3001_p13  ;;  %p2699_p1 = por %p2698_p0, %p2697_p12 }
  0x6d   : > { %p2693_p9 = pneg %p2692_p7 }
  0x6f   : > { %p2700_p4 = pnand %p2699_p1, %p2693_p9 }
  0x71   : > { %2703 = shalt.err (!%p2700_p4)
}
  0x72   : > { %2495 = dma.hbm_to_vmem [thread:$0]  (!%p2985_p11), %s3479_s6, 2048, %s342_s8, [#allocation11], %s2859_s29, %s2859_s29, %s2860_s15  }
  0x73   : > { %s38_s30 = sadd.s32 1, %s2850_s13  ;;  %s50_s24 = sadd.s32 1, %s2842_s11 }
  0x74   : > { %p39_p13 = scmp.ge.s32.totalorder %s38_s30, 2  ;;  %p57_p2 = scmp.ne.s32.totalorder %s2842_s11, %s2838_s10 }
  0x75   : > { %p58_p8 = scmp.eq.s32.totalorder %s2854_s14, 0  ;;  %p2508_p6 = scmp.lt.s32.totalorder %s2854_s14, 2 }
  0x76   : > { %s3528_s30 = smov (%p39_p13, %s38_s30), 0  ;;  %p3506_p3 = scmp.ne.s32.totalorder %s3499_s18, 0 }
  0x77   : > { %p59_p10 = por %p58_p8, %p57_p2  ;;  %s45_s9 = ssub.s32 %s2850_s13, %s3528_s30 }
  0x78   : > { %p3104_p5 = por %p3506_p3, %p57_p2  ;;  %s358_s16 = sand.u32 1, %s2842_s11  }
  0x79   : > { %p48_p7 = scmp.eq.s32.totalorder %s45_s9, 0  ;;  %s1623_s8 = sshll.u32 %s358_s16, 5 }
  0x7a   : > { %s1649_s22 = sshll.u32 %s2850_s13, 9  ;;  %s362_s28 = scalar_lea.vmem [#allocation4], %s1623_s8 }
  0x7b   : > { %s3113_s25 = scalar_select %p48_p7, %s2842_s11, %s50_s24  }
  0x7c   : > { %s3118_s23 = scalar_lea.hbm %s3473_s0, %s1649_s22  ;;  %s370_s26 = sshll.u32 %s362_s28, 4  ;;  %s3126_s26 = int_to_ptr.vmem [resolvable:$true] %s370_s26 }
  0x7d   : > { %p3122_p11 = pnand %p2508_p6, %p59_p10  ;;  %s3128_s24 = scalar_lea.sflag [#allocation5], %s358_s16 }
  0x7e   : > { %s2704_s9 = scalar_lea.hbm %s3118_s23, 512  ;;  %s2709_s27 = scalar_lea.hbm %s3473_s0, 1024 }
  0x7f   : > { %p2705_p9 = scmp.ne.s32.totalorder %s3118_s23, %s2704_s9  ;;  %p2706_p12 = pneg %p3122_p11 }
  0x80   : > { %p2710_p4 = scmp.lt.u32.totalorder %s3118_s23, %s3473_s0  ;;  %p2711_p13 = scmp.lt.u32.totalorder %s2709_s27, %s2704_s9 }
  0x81   : > { %p2707_p0 = pnand %p2706_p12, %p2705_p9  ;;  %p2713_p8 = scmp.lt.u32.totalorder %s2704_s9, %s3118_s23 }
  0x82   : > { %p2712_p2 = por %p2711_p13, %p2710_p4 }
  0x83   : > { %p2708_p1 = pneg %p2707_p0 }
  0x84   : > { %p2714_p6 = por %p2713_p8, %p2712_p2 }
  0x86   : > { %p2715_p10 = pnand %p2714_p6, %p2708_p1 }
  0x88   : > { %2718 = shalt.err (!%p2715_p10)
}
  0x89   : > { %s2719_s16 = scalar_lea.vmem %s3126_s26, 512  ;;  %s2862_s8 = smov [#allocation4]  }
  0x8a   : > { %p2720_p3 = scmp.ne.s32.totalorder %s3126_s26, %s2719_s16  ;;  %s2724_s22 = sshll.u32 %s2862_s8, 4  ;;  %s2725_s22 = int_to_ptr.vmem [resolvable:$false] %s2724_s22 }
  0x8b   : > { %s2726_s20 = scalar_lea.vmem %s2725_s22, 1024  ;;  %p2727_p0 = scmp.lt.s32.totalorder %s3126_s26, %s2725_s22 }
  0x8c   : > { %p2722_p7 = pnand %p2720_p3, %p2706_p12  ;;  %p2728_p4 = scmp.lt.s32.totalorder %s2726_s20, %s2719_s16 }
  0x8e   : > { %p2723_p9 = pneg %p2722_p7  ;;  %p2729_p13 = por %p2728_p4, %p2727_p0 }
  0x90   : > { %p2730_p2 = pnand %p2729_p13, %p2723_p9 }
  0x92   : > { %2733 = shalt.err (!%p2730_p2)
}
  0x93   : > { %2499 = dma.hbm_to_vmem [thread:$0]  (!%p3122_p11), %s3118_s23, 512, %s3126_s26, %s3128_s24, %s2859_s29, %s2859_s29, %s2860_s15  }
  0x94   : > { %p3509_p12 = scmp.ne.s32.totalorder %s3503_s21, 0 }
  0x95   : > { %s3162_s9 = sand.u32 (!%p3509_p12), 1, %s2838_s10   ;;  %p3510_p1 = scmp.ne.s32.totalorder (!%p3509_p12), %s3500_s19, 0 }
  0x96   : > { %382 = sbr.rel (%p3509_p12) target bundleno = 2049 (0x801), region = 52  ;;  %s1627_s27 = sshll.u32 (!%p3509_p12), %s3162_s9, 5 }
  0x97   : > { %s385_s28 = scalar_lea.sflag (!%p3509_p12), [#allocation5], %s3162_s9  ;;  %s3166_s16 = scalar_lea.vmem (!%p3509_p12), [#allocation4], %s1627_s27 }
  0x9d   : > { %2813 = dma.done.wait (%p3510_p1), %s385_s28, 512  }
  0x9e   : > { %2815 = vsyncadd (%p3510_p1), %s385_s28, 4294966784  ;;  %p3511_p11 = scmp.ne.s32.totalorder %s3498_s17, 0 }
  0xa0   : > { %2817 = dma.done.wait (%p3511_p11), [#allocation8], 2304  }
  0xa1   : > { %2819 = vsyncadd (%p3511_p11), [#allocation8], 4294964992 }
  0xa2   : > { %2821 = dma.done.wait (%p3511_p11), [#allocation11], 6144  }
  0xa3   : > { %2823 = vsyncadd (%p3511_p11), [#allocation11], 4294961152  ;;  %s3180_s21 = scalar_lea.vmem [#allocation13], %s1627_s27  ;;  %p1633_p8 = scmp.ne.s32.totalorder %s2846_s12, 0 }
  0xa4   : > { %v453_v0 = vld [vmem:[%s3478_s5] sm:$0xff] (!%p1633_p8)  ;;  %v454_v1 = vld [vmem:[%s3478_s5 + $0x8] sm:$0xff] (!%p1633_p8) }
  0xa5   : > { %452 = sbr.rel (%p1633_p8) target bundleno = 172 (0xac), region = 76  ;;  %455 = vst [vmem:[#allocation14] sm:$0xff] (!%p1633_p8), %v453_v0  ;;  %456 = vst [vmem:[#allocation14 + $0x8] sm:$0xff] (!%p1633_p8), %v454_v1 }
  0xac PF: > { %v461_v2 = vld [vmem:[#allocation7] sm:$0xff]  ;;  %v462_v3 = vld [vmem:[#allocation7 + $0x8] sm:$0xff]  ;;  %vm470_vm0 = vcmask 130048   ;;  %v572_v6 = vld [vmem:[#allocation10] sm:$0xff]  ;;  %v2863_v8 = vmov 0.0|0.0   ;;  %vm2864_vm1 = vmmov 0  }
  0xad   : > { %v457_v4 = vld [vmem:[%s3166_s16] sm:$0xff]  ;;  %v2199_v5 = vpack.c.bf16 %v462_v3, %v461_v2  ;;  %v573_v7 = vld [vmem:[#allocation10 + $0x8] sm:$0xff]  ;;  %2227 = vmatprep.subr.bf16.mxu0 %v2863_v8  ;;  %v2865_v10 = vmov 0.0   ;;  %v458_v11 = vld [vmem:[%s3166_s16 + $0x8] sm:$0xff]  ;;  %s3512_s4 = sld [smem:[#allocation23_spill]]  ;;  %s3513_s27 = sld [smem:[#allocation24_spill]] }
  0xae   : > { %1837 = vmatprep.mubr.msk.f32.mxu1 %vm470_vm0, %v457_v4  ;;  %v3192_v9 = vpack.c.bf16 %v573_v7, %v572_v6  ;;  %1910 = vmatprep.mubr.msk.f32.mxu0 %vm2864_vm1, %v2865_v10  ;;  %v574_v12 = vld [vmem:[#allocation10 + $0x10] sm:$0xff]  ;;  %v575_v13 = vld [vmem:[#allocation10 + $0x18] sm:$0xff]  ;;  %v459_v14 = vld [vmem:[%s3166_s16 + $0x10] sm:$0xff]  ;;  %s2866_s28 = smov [#allocation14]   ;;  %p3514_p10 = scmp.ne.s32.totalorder %s3499_s18, 0 }
  0xaf   : > { %2200 = vmatprep.subr.bf16.mxu1 %v2199_v5  ;;  %v3202_v15 = vpack.c.bf16 %v575_v13, %v574_v12  ;;  %v576_v16 = vld [vmem:[#allocation10 + $0x20] sm:$0xff]  ;;  %v577_v17 = vld [vmem:[#allocation10 + $0x28] sm:$0xff]  ;;  %v578_v20 = vld [vmem:[#allocation10 + $0x30] sm:$0xff] }
  0xb0   : > { %2202 = vmatpush3.bf16.msra.mxu1 %v2199_v5  ;;  %2229 = vmatpush3.bf16.msra.mxu0 %v3192_v9  ;;  %v460_v18 = vld [vmem:[%s3166_s16 + $0x18] sm:$0xff]  ;;  %v3210_v19 = vpack.c.bf16 %v577_v17, %v576_v16  ;;  %v579_v21 = vld [vmem:[#allocation10 + $0x38] sm:$0xff]  ;;  %v580_v23 = vld [vmem:[#allocation10 + $0x40] sm:$0xff]  ;;  %s1463_s16 = sshll.u32 %s2866_s28, 4  ;;  %s1464_s16 = int_to_ptr.vmem [resolvable:$true] %s1463_s16 }
  0xb1   : > { %2203 = vmatprep.subr.bf16.mxu1 %v2863_v8  ;;  %2230 = vmatprep.subr.bf16.mxu0 %v2863_v8  ;;  %v3219_v22 = vpack.c.bf16 %v579_v21, %v578_v20  ;;  %v581_v24 = vld [vmem:[#allocation10 + $0x48] sm:$0xff]  ;;  %v582_v26 = vld [vmem:[#allocation10 + $0x50] sm:$0xff]  ;;  %v583_v27 = vld [vmem:[#allocation10 + $0x58] sm:$0xff]  ;;  %s2734_s29 = scalar_lea.vmem %s1464_s16, 256  ;;  %p2741_p9 = scmp.lt.s32.totalorder %s1464_s16, %s1464_s16 }
  0xb2   : > { %v3225_v25 = vpack.c.bf16 %v581_v24, %v580_v23  ;;  %v3231_v28 = vpack.c.bf16 %v583_v27, %v582_v26  ;;  %v584_v29 = vld [vmem:[#allocation10 + $0x60] sm:$0xff]  ;;  %v585_v30 = vld [vmem:[#allocation10 + $0x68] sm:$0xff]  ;;  %v586_v32 = vld [vmem:[#allocation10 + $0x70] sm:$0xff]  ;;  %p2735_p6 = scmp.ne.s32.totalorder %s1464_s16, %s2734_s29  ;;  %p2742_p0 = scmp.lt.s32.totalorder %s2734_s29, %s2734_s29 }
  0xb3   : > { %1838 = vmatmul.mubr.msk.f32.vlgmr.msra.gmra.mrb[0].mxu1 %vm470_vm0, %v458_v11  ;;  %v2222_v31 = vpack.c.bf16 %v585_v30, %v584_v29  ;;  %v587_v33 = vld [vmem:[#allocation10 + $0x78] sm:$0xff]  ;;  %v588_v35 = vld [vmem:[#allocation14] sm:$0xff]  ;;  %v1634_v36 = vld [vmem:[%s3512_s4] ss:$0 sm:$0xff] }
  0xb4   : > { %2205 = vmatpush3.bf16.msra.mxu1 %v3192_v9  ;;  %1840 = vmatprep.mubr.msk.f32.mxu1 %vm470_vm0, %v459_v14  ;;  %v2225_v34 = vpack.c.bf16 %v587_v33, %v586_v32  ;;  %v889_v49 = vld [vmem:[#allocation9] sm:$0xff]  ;;  %v890_v50 = vld [vmem:[#allocation9 + $0x8] sm:$0xff]  ;;  %v891_v55 = vld [vmem:[#allocation9 + $0x10] sm:$0xff]  ;;  %p2736_p3 = pnand %p2735_p6, %p3514_p10  ;;  %p2743_p4 = por %p2742_p0, %p2741_p9 }
  0xb5   : > { %2206 = vmatprep.subr.bf16.mxu1 %v2863_v8  ;;  %2232 = vmatpush3.bf16.msra.mxu0 %v3202_v15  ;;  %v2299_v51 = vpack.c.bf16 %v890_v50, %v889_v49  ;;  %v892_v56 = vld [vmem:[#allocation9 + $0x18] sm:$0xff]  ;;  %v893_v59 = vld [vmem:[#allocation9 + $0x20] sm:$0xff]  ;;  %v894_v60 = vld [vmem:[#allocation9 + $0x28] sm:$0xff] }
  0xb6   : > { %2233 = vmatprep.subr.bf16.mxu0 %v2863_v8  ;;  %v2303_v57 = vpack.c.bf16 %v892_v56, %v891_v55  ;;  %v2307_v61 = vpack.c.bf16 %v894_v60, %v893_v59  ;;  %v895_v62 = vld [vmem:[#allocation9 + $0x30] sm:$0xff]  ;;  %v896_v63 = vld [vmem:[#allocation9 + $0x38] sm:$0xff]  ;;  %v897_v1 = vld [vmem:[#allocation9 + $0x40] sm:$0xff]  ;;  %p2737_p7 = pneg %p2736_p3 }
  0xb7   : > { %1841 = vmatmul.mubr.msk.f32.gmra.mrb[2].mxu1 %vm470_vm0, %v460_v18  ;;  %v2311_v0 = vpack.c.bf16 %v896_v63, %v895_v62  ;;  %v898_v2 = vld [vmem:[#allocation9 + $0x48] sm:$0xff]  ;;  %v899_v4 = vld [vmem:[#allocation9 + $0x50] sm:$0xff]  ;;  %v900_v5 = vld [vmem:[#allocation9 + $0x58] sm:$0xff] }
  0xb8   : > { %2208 = vmatpush3.bf16.msra.mxu1 %v3202_v15  ;;  %1875 = vmatprep.mubr.msk.f32.mxu1 %vm2864_vm1, %v2865_v10  ;;  %v2315_v3 = vpack.c.bf16 %v898_v2, %v897_v1  ;;  %v2319_v6 = vpack.c.bf16 %v900_v5, %v899_v4  ;;  %v901_v7 = vld [vmem:[#allocation9 + $0x60] sm:$0xff]  ;;  %v903_v12 = vld [vmem:[#allocation9 + $0x70] sm:$0xff]  ;;  %v904_v13 = vld [vmem:[#allocation9 + $0x78] sm:$0xff]  ;;  %p2744_p13 = pnand %p2743_p4, %p2737_p7 }
  0xb9   : > { %2209 = vmatprep.subr.bf16.mxu1 %v2863_v8  ;;  %2235 = vmatpush3.bf16.msra.mxu0 %v3210_v19  ;;  %v2327_v14 = vpack.c.bf16 %v904_v13, %v903_v12  ;;  %v1004_v16 = vld [vmem:[#allocation10 + $0x88] sm:$0xff]  ;;  %v1005_v18 = vld [vmem:[#allocation10 + $0x90] sm:$0xff]  ;;  %v1007_v21 = vld [vmem:[#allocation10 + $0xa0] sm:$0xff] }
  0xba   : > { %2236 = vmatprep.subr.bf16.mxu0 %v2863_v8  ;;  %v1009_v24 = vld [vmem:[#allocation10 + $0xb0] sm:$0xff]  ;;  %v1011_v27 = vld [vmem:[#allocation10 + $0xc0] sm:$0xff]  ;;  %v1322_v56 = vld [vmem:[#allocation12 + $0x8] sm:$0xff] }
  0xbb   : > { %v1013_v30 = vld [vmem:[#allocation10 + $0xd0] sm:$0xff]  ;;  %v1015_v33 = vld [vmem:[#allocation10 + $0xe0] sm:$0xff]  ;;  %v1324_v1 = vld [vmem:[#allocation12 + $0x18] sm:$0xff] }
  0xbc   : > { %2211 = vmatpush3.bf16.msra.mxu1 %v3210_v19  ;;  %v1326_v4 = vld [vmem:[#allocation12 + $0x28] sm:$0xff] }
  0xbd   : > { %2212 = vmatprep.subr.bf16.mxu1 %v2863_v8  ;;  %2238 = vmatpush3.bf16.msra.mxu0 %v3219_v22  ;;  %v1330_v12 = vld [vmem:[#allocation12 + $0x48] sm:$0xff] }
  0xbe   : > { %2239 = vmatprep.subr.bf16.mxu0 %v2863_v8 }
  0xc0   : > { %2214 = vmatpush3.bf16.msra.mxu1 %v3219_v22 }
  0xc1   : > { %2215 = vmatprep.subr.bf16.mxu1 %v2863_v8  ;;  %2241 = vmatpush3.bf16.msra.mxu0 %v3225_v25 }
  0xc2   : > { %2242 = vmatprep.subr.bf16.mxu0 %v2863_v8 }
  0xc4   : > { %2217 = vmatpush3.bf16.msra.mxu1 %v3225_v25 }
  0xc5   : > { %2218 = vmatprep.subr.bf16.mxu1 %v2863_v8  ;;  %2244 = vmatpush3.bf16.msra.mxu0 %v3231_v28 }
  0xc6   : > { %2245 = vmatprep.subr.bf16.mxu0 %v2863_v8 }
  0xc8   : > { %2220 = vmatpush3.bf16.msra.mxu1 %v3231_v28 }
  0xc9   : > { %2221 = vmatprep.subr.bf16.mxu1 %v2863_v8  ;;  %2247 = vmatpush3.bf16.msra.mxu0 %v2222_v31 }
  0xca   : > { %2248 = vmatprep.subr.bf16.mxu0 %v2863_v8 }
  0xcc   : > { %2223 = vmatpush3.bf16.msra.mxu1 %v2222_v31 }
  0xcd   : > { %2224 = vmatprep.subr.bf16.mxu1 %v2863_v8  ;;  %2250 = vmatpush3.bf16.msra.mxu0 %v2225_v34 }
  0xce   : > { %2275 = vmatprep.subr.bf16.mxu0 %v2863_v8 }
  0xd0   : > { %2226 = vmatpush3.bf16.msra.mxu1 %v2225_v34 }
  0xd1   : > { %2251 = vmatprep.subr.bf16.mxu1 %v2863_v8 }
  0xd3   : > { %1876 = vmatmul.mubr.f32.vlgmr.msra.gmra.mrb[4].mxu1 %v588_v35 }
  0xd4   : > { %2253 = vmatpush3.bf16.msra.mxu1 %v3192_v9  ;;  %1945 = vmatprep.mubr.msk.f32.mxu1 %vm2864_vm1, %v2865_v10 }
  0xd5   : > { %2254 = vmatprep.subr.bf16.mxu1 %v2863_v8 }
  0xd8   : > { %2256 = vmatpush3.bf16.msra.mxu1 %v3202_v15 }
  0xd9   : > { %2257 = vmatprep.subr.bf16.mxu1 %v2863_v8 }
  0xdc   : > { %2259 = vmatpush3.bf16.msra.mxu1 %v3210_v19 }
  0xdd   : > { %2260 = vmatprep.subr.bf16.mxu1 %v2863_v8 }
  0xe0   : > { %2262 = vmatpush3.bf16.msra.mxu1 %v3219_v22 }
  0xe1   : > { %2263 = vmatprep.subr.bf16.mxu1 %v2863_v8 }
  0xe4   : > { %2265 = vmatpush3.bf16.msra.mxu1 %v3225_v25 }
  0xe5   : > { %2266 = vmatprep.subr.bf16.mxu1 %v2863_v8 }
  0xe8   : > { %2268 = vmatpush3.bf16.msra.mxu1 %v3231_v28 }
  0xe9   : > { %2269 = vmatprep.subr.bf16.mxu1 %v2863_v8 }
  0xec   : > { %2271 = vmatpush3.bf16.msra.mxu1 %v2222_v31 }
  0xed   : > { %2272 = vmatprep.subr.bf16.mxu1 %v2863_v8 }
  0xf0   : > { %2274 = vmatpush3.bf16.msra.mxu1 %v2225_v34 }
  0xf1   : > { %2300 = vmatprep.subr.bf16.mxu1 %v2299_v51 }
 0x186   : > { %v1839_v37 = vpop.f32.mrb[0].mxu1 }
 0x187   : > { %v555_v38 = vadd.f32 %v1839_v37, %v1634_v36  ;;  %v549_v39 = vpop.f32.mrb[1].mxu1  ;;  %v1018_v37 = vld [vmem:[#allocation10 + $0xf8] sm:$0xff] }
 0x188   : > { %v550_v44 = vadd.f32 %v1634_v36, %v549_v39 }
 0x18a   : > { %v1842_v40 = vpop.f32.mrb[2].mxu1 }
 0x18b   : > { %v3261_v41 = vadd.f32 %v1842_v40, %v1634_v36  ;;  %v559_v42 = vpop.f32.mrb[3].mxu1 }
 0x18c   : > { %v3263_v43 = vadd.f32 %v1634_v36, %v559_v42  ;;  %v1017_v36 = vld [vmem:[#allocation10 + $0xf0] sm:$0xff] }
 0x1a6   : > { %v656_v45 = vpop.f32.mrb[4].mxu1 }
 0x1a7   : > { %v657_v46 = vadd.f32 %v656_v45, %v550_v44  ;;  %v1877_v47 = vpop.f32.mrb[5].mxu1 }
 0x1a9   : > { %2576 = vtanh.f32 %v657_v46  ;;  %v1020_v46 = vld [vmem:[#allocation14 + $0x8] sm:$0xff] }
 0x1b3   : > { %v2577_v48 = vpop.eup %2576 }
 0x1b4   : > { %1911 = vmatmul.mubr.f32.vlgmr.msra.gmra.mrb[0].mxu0 %v2577_v48 }
 0x1b5   : > { %2277 = vmatpush3.bf16.msra.mxu0 %v3192_v9  ;;  %1980 = vmatprep.mubr.msk.f32.mxu0 %vm2864_vm1, %v2865_v10  ;;  %v902_v9 = vld [vmem:[#allocation9 + $0x68] sm:$0xff] }
 0x1b6   : > { %2278 = vmatprep.subr.bf16.mxu0 %v2863_v8  ;;  %v2323_v11 = vpack.c.bf16 %v902_v9, %v901_v7  ;;  %v1328_v7 = vld [vmem:[#allocation12 + $0x38] sm:$0xff] }
 0x1b9   : > { %2280 = vmatpush3.bf16.msra.mxu0 %v3202_v15  ;;  %v1003_v15 = vld [vmem:[#allocation10 + $0x80] sm:$0xff] }
 0x1ba   : > { %2281 = vmatprep.subr.bf16.mxu0 %v2863_v8  ;;  %v3282_v17 = vpack.c.bf16 %v1004_v16, %v1003_v15  ;;  %v1332_v15 = vld [vmem:[#allocation12 + $0x58] sm:$0xff] }
 0x1bd   : > { %2283 = vmatpush3.bf16.msra.mxu0 %v3210_v19  ;;  %v1006_v19 = vld [vmem:[#allocation10 + $0x98] sm:$0xff] }
 0x1be   : > { %2284 = vmatprep.subr.bf16.mxu0 %v2863_v8  ;;  %v3286_v20 = vpack.c.bf16 %v1006_v19, %v1005_v18  ;;  %v1334_v18 = vld [vmem:[#allocation12 + $0x68] sm:$0xff] }
 0x1c1   : > { %2286 = vmatpush3.bf16.msra.mxu0 %v3219_v22  ;;  %v1008_v22 = vld [vmem:[#allocation10 + $0xa8] sm:$0xff] }
 0x1c2   : > { %2287 = vmatprep.subr.bf16.mxu0 %v2863_v8  ;;  %v3290_v23 = vpack.c.bf16 %v1008_v22, %v1007_v21  ;;  %v1336_v21 = vld [vmem:[#allocation12 + $0x78] sm:$0xff] }
 0x1c5   : > { %2289 = vmatpush3.bf16.msra.mxu0 %v3225_v25  ;;  %v1010_v25 = vld [vmem:[#allocation10 + $0xb8] sm:$0xff] }
 0x1c6   : > { %2290 = vmatprep.subr.bf16.mxu0 %v2863_v8  ;;  %v3294_v26 = vpack.c.bf16 %v1010_v25, %v1009_v24 }
 0x1c9   : > { %2292 = vmatpush3.bf16.msra.mxu0 %v3231_v28  ;;  %v1012_v28 = vld [vmem:[#allocation10 + $0xc8] sm:$0xff] }
 0x1ca   : > { %2293 = vmatprep.subr.bf16.mxu0 %v2863_v8  ;;  %v3298_v29 = vpack.c.bf16 %v1012_v28, %v1011_v27  ;;  %v1641_v28 = vld [vmem:[%s3513_s27] ss:$0 sm:$0xff] }
 0x1cd   : > { %2295 = vmatpush3.bf16.msra.mxu0 %v2222_v31  ;;  %v1014_v31 = vld [vmem:[#allocation10 + $0xd8] sm:$0xff] }
 0x1ce   : > { %2296 = vmatprep.subr.bf16.mxu0 %v2863_v8  ;;  %v3302_v32 = vpack.c.bf16 %v1014_v31, %v1013_v30 }
 0x1d1   : > { %2298 = vmatpush3.bf16.msra.mxu0 %v2225_v34  ;;  %v1016_v34 = vld [vmem:[#allocation10 + $0xe8] sm:$0xff] }
 0x1d2   : > { %2331 = vmatprep.subr.bf16.mxu0 %v2863_v8  ;;  %v3306_v35 = vpack.c.bf16 %v1016_v34, %v1015_v33 }
 0x287   : > { %v730_v52 = vpop.f32.mrb[0].mxu0 }
 0x288   : > { %v731_v53 = vadd.f32 %v730_v52, %v555_v38  ;;  %v1912_v54 = vpop.f32.mrb[1].mxu0  ;;  %v3310_v38 = vpack.c.bf16 %v1018_v37, %v1017_v36 }
 0x28a   : > { %2578 = vtanh.f32 %v731_v53 }
 0x294   : > { %v2579_v58 = vpop.eup %2578 }
 0x295   : > { %1946 = vmatmul.mubr.f32.vlgmr.msra.gmra.mrb[6].mxu1 %v2579_v58 }
 0x296   : > { %2302 = vmatpush3.bf16.msra.mxu1 %v2299_v51  ;;  %2015 = vmatprep.mubr.f32.mxu1 %v2577_v48  ;;  %v3358_v51 = vld [vmem:[%s3512_s4 + $0x1] ss:$0 sm:$0xff] }
 0x297   : > { %2304 = vmatprep.subr.bf16.mxu1 %v2303_v57 }
 0x29a   : > { %2306 = vmatpush3.bf16.msra.mxu1 %v2303_v57 }
 0x29b   : > { %2308 = vmatprep.subr.bf16.mxu1 %v2307_v61 }
 0x29e   : > { %2310 = vmatpush3.bf16.msra.mxu1 %v2307_v61 }
 0x29f   : > { %2312 = vmatprep.subr.bf16.mxu1 %v2311_v0 }
 0x2a2   : > { %2314 = vmatpush3.bf16.msra.mxu1 %v2311_v0  ;;  %v1323_v0 = vld [vmem:[#allocation12 + $0x10] sm:$0xff] }
 0x2a3   : > { %2316 = vmatprep.subr.bf16.mxu1 %v2315_v3  ;;  %v2431_v2 = vpack.c.bf16 %v1324_v1, %v1323_v0 }
 0x2a6   : > { %2318 = vmatpush3.bf16.msra.mxu1 %v2315_v3 }
 0x2a7   : > { %2320 = vmatprep.subr.bf16.mxu1 %v2319_v6 }
 0x2aa   : > { %2322 = vmatpush3.bf16.msra.mxu1 %v2319_v6  ;;  %v1327_v6 = vld [vmem:[#allocation12 + $0x30] sm:$0xff] }
 0x2ab   : > { %2324 = vmatprep.subr.bf16.mxu1 %v2323_v11  ;;  %v2439_v9 = vpack.c.bf16 %v1328_v7, %v1327_v6 }
 0x2ae   : > { %2326 = vmatpush3.bf16.msra.mxu1 %v2323_v11  ;;  %v1329_v11 = vld [vmem:[#allocation12 + $0x40] sm:$0xff] }
 0x2af   : > { %2328 = vmatprep.subr.bf16.mxu1 %v2327_v14  ;;  %v2443_v13 = vpack.c.bf16 %v1330_v12, %v1329_v11 }
 0x2b2   : > { %2330 = vmatpush3.bf16.msra.mxu1 %v2327_v14  ;;  %v1331_v14 = vld [vmem:[#allocation12 + $0x50] sm:$0xff] }
 0x2b3   : > { %2355 = vmatprep.subr.bf16.mxu1 %v2863_v8  ;;  %v2447_v16 = vpack.c.bf16 %v1332_v15, %v1331_v14 }
 0x2b5   : > { %2016 = vmatmul.mubr.f32.vlgmr.msra.gmra.mrb[8].mxu1 %v2579_v58 }
 0x2b6   : > { %2357 = vmatpush3.bf16.msra.mxu1 %v3282_v17 }
 0x2b7   : > { %2358 = vmatprep.subr.bf16.mxu1 %v2863_v8 }
 0x2ba   : > { %2360 = vmatpush3.bf16.msra.mxu1 %v3286_v20 }
 0x2bb   : > { %2361 = vmatprep.subr.bf16.mxu1 %v2863_v8 }
 0x2be   : > { %2363 = vmatpush3.bf16.msra.mxu1 %v3290_v23 }
 0x2bf   : > { %2364 = vmatprep.subr.bf16.mxu1 %v2863_v8 }
 0x2c2   : > { %2366 = vmatpush3.bf16.msra.mxu1 %v3294_v26 }
 0x2c3   : > { %2367 = vmatprep.subr.bf16.mxu1 %v2863_v8 }
 0x2c6   : > { %2369 = vmatpush3.bf16.msra.mxu1 %v3298_v29 }
 0x2c7   : > { %2370 = vmatprep.subr.bf16.mxu1 %v2863_v8 }
 0x2ca   : > { %2372 = vmatpush3.bf16.msra.mxu1 %v3302_v32 }
 0x2cb   : > { %2373 = vmatprep.subr.bf16.mxu1 %v2863_v8 }
 0x2ce   : > { %2375 = vmatpush3.bf16.msra.mxu1 %v3306_v35 }
 0x2cf   : > { %2376 = vmatprep.subr.bf16.mxu1 %v2863_v8 }
 0x2d2   : > { %2378 = vmatpush3.bf16.msra.mxu1 %v3310_v38 }
 0x2d3   : > { %2403 = vmatprep.subr.bf16.mxu1 %v2863_v8 }
 0x368   : > { %v804_v39 = vpop.f32.mrb[6].mxu1 }
 0x369   : > { %v805_v40 = vadd.f32 %v804_v39, %v3263_v43  ;;  %v1947_v42 = vpop.f32.mrb[7].mxu1 }
 0x36b   : > { %2580 = vtanh.f32 %v805_v40 }
 0x375   : > { %v2581_v44 = vpop.eup %2580 }
 0x376   : > { %1981 = vmatmul.mubr.f32.vlgmr.msra.gmra.mrb[2].mxu0 %v2581_v44  ;;  %2018 = vmatprep.mubr.f32.mxu1 %v2581_v44 }
 0x377   : > { %2333 = vmatpush3.bf16.msra.mxu0 %v3282_v17  ;;  %2053 = vmatprep.mubr.msk.f32.mxu0 %vm2864_vm1, %v2865_v10 }
 0x378   : > { %2334 = vmatprep.subr.bf16.mxu0 %v2863_v8 }
 0x37b   : > { %2336 = vmatpush3.bf16.msra.mxu0 %v3286_v20 }
 0x37c   : > { %2337 = vmatprep.subr.bf16.mxu0 %v2863_v8 }
 0x37f   : > { %2339 = vmatpush3.bf16.msra.mxu0 %v3290_v23 }
 0x380   : > { %2340 = vmatprep.subr.bf16.mxu0 %v2863_v8 }
 0x383   : > { %2342 = vmatpush3.bf16.msra.mxu0 %v3294_v26 }
 0x384   : > { %2343 = vmatprep.subr.bf16.mxu0 %v2863_v8 }
 0x387   : > { %2345 = vmatpush3.bf16.msra.mxu0 %v3298_v29 }
 0x388   : > { %v3326_v43 = vpop.f32.mrb[8].mxu1  ;;  %2346 = vmatprep.subr.bf16.mxu0 %v2863_v8 }
 0x389   : > { %v979_v45 = vpop.f32.mrb[9].mxu1  ;;  %v985_v60 = vadd.f32 %v3326_v43, %v3358_v51 }
 0x38a   : > { %v980_v52 = vadd.f32 %v3358_v51, %v979_v45 }
 0x38b   : > { %2348 = vmatpush3.bf16.msra.mxu0 %v3302_v32 }
 0x38c   : > { %2349 = vmatprep.subr.bf16.mxu0 %v2863_v8 }
 0x38f   : > { %2351 = vmatpush3.bf16.msra.mxu0 %v3306_v35 }
 0x390   : > { %2352 = vmatprep.subr.bf16.mxu0 %v2863_v8 }
 0x393   : > { %2354 = vmatpush3.bf16.msra.mxu0 %v3310_v38 }
 0x394   : > { %2379 = vmatprep.subr.bf16.mxu0 %v2863_v8 }
 0x396   : > { %2054 = vmatmul.mubr.f32.vlgmr.msra.gmra.mrb[4].mxu0 %v1020_v46 }
 0x397   : > { %2381 = vmatpush3.bf16.msra.mxu0 %v3282_v17  ;;  %2123 = vmatprep.mubr.msk.f32.mxu0 %vm2864_vm1, %v2865_v10 }
 0x398   : > { %2382 = vmatprep.subr.bf16.mxu0 %v2863_v8 }
 0x39b   : > { %2384 = vmatpush3.bf16.msra.mxu0 %v3286_v20 }
 0x39c   : > { %2385 = vmatprep.subr.bf16.mxu0 %v2863_v8 }
 0x39f   : > { %2387 = vmatpush3.bf16.msra.mxu0 %v3290_v23 }
 0x3a0   : > { %2388 = vmatprep.subr.bf16.mxu0 %v2863_v8 }
 0x3a3   : > { %2390 = vmatpush3.bf16.msra.mxu0 %v3294_v26 }
 0x3a4   : > { %2391 = vmatprep.subr.bf16.mxu0 %v2863_v8 }
 0x3a7   : > { %2393 = vmatpush3.bf16.msra.mxu0 %v3298_v29 }
 0x3a8   : > { %2394 = vmatprep.subr.bf16.mxu0 %v2863_v8 }
 0x3ab   : > { %2396 = vmatpush3.bf16.msra.mxu0 %v3302_v32 }
 0x3ac   : > { %2397 = vmatprep.subr.bf16.mxu0 %v2863_v8 }
 0x3af   : > { %2399 = vmatpush3.bf16.msra.mxu0 %v3306_v35 }
 0x3b0   : > { %2400 = vmatprep.subr.bf16.mxu0 %v2863_v8 }
 0x3b3   : > { %2402 = vmatpush3.bf16.msra.mxu0 %v3310_v38 }
 0x449   : > { %v878_v47 = vpop.f32.mrb[2].mxu0 }
 0x44a   : > { %v879_v48 = vadd.f32 %v878_v47, %v3261_v41  ;;  %v1982_v49 = vpop.f32.mrb[3].mxu0 }
 0x44c   : > { %2582 = vtanh.f32 %v879_v48 }
 0x456   : > { %v2583_v50 = vpop.eup %2582 }
 0x457   : > { %884 = vst [vmem:[#allocation14] sm:$0xff] %v2583_v50  ;;  %2019 = vmatmul.mubr.f32.gmra.mrb[10].mxu1 %v2583_v50 }
 0x458   : > { %2088 = vmatprep.mubr.msk.f32.mxu1 %vm2864_vm1, %v2865_v10 }
 0x469   : > { %v1088_v53 = vpop.f32.mrb[4].mxu0 }
 0x46a   : > { %v1089_v54 = vadd.f32 %v1088_v53, %v980_v52  ;;  %v2055_v55 = vpop.f32.mrb[5].mxu0 }
 0x46c   : > { %2584 = vtanh.f32 %v1089_v54 }
 0x476   : > { %v2585_v41 = vpop.eup %2584 }
 0x477   : > { %2089 = vmatmul.mubr.f32.vlgmr.msra.gmra.mrb[12].mxu1 %v2585_v41 }
 0x478   : > { %2405 = vmatpush3.bf16.msra.mxu1 %v3282_v17  ;;  %2158 = vmatprep.mubr.msk.f32.mxu1 %vm2864_vm1, %v2865_v10  ;;  %v1321_v10 = vld [vmem:[#allocation12] sm:$0xff] }
 0x479   : > { %2406 = vmatprep.subr.bf16.mxu1 %v2863_v8  ;;  %v2427_v57 = vpack.c.bf16 %v1322_v56, %v1321_v10  ;;  %v1333_v17 = vld [vmem:[#allocation12 + $0x60] sm:$0xff] }
 0x47a   : > { %v2451_v19 = vpack.c.bf16 %v1334_v18, %v1333_v17 }
 0x47b   : > { %2428 = vmatprep.subr.bf16.mxu0 %v2427_v57 }
 0x47c   : > { %2408 = vmatpush3.bf16.msra.mxu1 %v3286_v20  ;;  %v1335_v20 = vld [vmem:[#allocation12 + $0x70] sm:$0xff] }
 0x47d   : > { %2409 = vmatprep.subr.bf16.mxu1 %v2863_v8  ;;  %v2455_v22 = vpack.c.bf16 %v1336_v21, %v1335_v20 }
 0x480   : > { %2411 = vmatpush3.bf16.msra.mxu1 %v3290_v23 }
 0x481   : > { %2412 = vmatprep.subr.bf16.mxu1 %v2863_v8 }
 0x484   : > { %2414 = vmatpush3.bf16.msra.mxu1 %v3294_v26 }
 0x485   : > { %2415 = vmatprep.subr.bf16.mxu1 %v2863_v8 }
 0x488   : > { %2417 = vmatpush3.bf16.msra.mxu1 %v3298_v29 }
 0x489   : > { %2418 = vmatprep.subr.bf16.mxu1 %v2863_v8 }
 0x48c   : > { %2420 = vmatpush3.bf16.msra.mxu1 %v3302_v32 }
 0x48d   : > { %2421 = vmatprep.subr.bf16.mxu1 %v2863_v8 }
 0x490   : > { %2423 = vmatpush3.bf16.msra.mxu1 %v3306_v35 }
 0x491   : > { %2424 = vmatprep.subr.bf16.mxu1 %v2863_v8  ;;  %v1325_v8 = vld [vmem:[#allocation12 + $0x20] sm:$0xff] }
 0x492   : > { %v2435_v5 = vpack.c.bf16 %v1326_v4, %v1325_v8 }
 0x494   : > { %2426 = vmatpush3.bf16.msra.mxu1 %v3310_v38 }
 0x52a   : > { %v2020_v58 = vpop.f32.mrb[10].mxu1 }
 0x52b   : > { %v989_v59 = vpop.f32.mrb[11].mxu1  ;;  %v995_v33 = vadd.f32 %v2020_v58, %v3358_v51 }
 0x52c   : > { %v990_v23 = vadd.f32 %v3358_v51, %v989_v59 }
 0x54a   : > { %v1162_v61 = vpop.f32.mrb[12].mxu1 }
 0x54b   : > { %v1163_v62 = vadd.f32 %v1162_v61, %v985_v60  ;;  %v2090_v63 = vpop.f32.mrb[13].mxu1 }
 0x54d   : > { %2586 = vtanh.f32 %v1163_v62 }
 0x557   : > { %v2587_v3 = vpop.eup %2586 }
 0x558   : > { %2124 = vmatmul.mubr.f32.vlgmr.msra.gmra.mrb[6].mxu0 %v2587_v3 }
 0x559   : > { %2430 = vmatpush3.bf16.msra.mxu0 %v2427_v57  ;;  %2193 = vmatprep.mubr.f32.mxu0 %v2585_v41 }
 0x55a   : > { %2432 = vmatprep.subr.bf16.mxu0 %v2431_v2 }
 0x55d   : > { %2434 = vmatpush3.bf16.msra.mxu0 %v2431_v2 }
 0x55e   : > { %2436 = vmatprep.subr.bf16.mxu0 %v2435_v5 }
 0x561   : > { %2438 = vmatpush3.bf16.msra.mxu0 %v2435_v5 }
 0x562   : > { %2440 = vmatprep.subr.bf16.mxu0 %v2439_v9 }
 0x565   : > { %2442 = vmatpush3.bf16.msra.mxu0 %v2439_v9 }
 0x566   : > { %2444 = vmatprep.subr.bf16.mxu0 %v2443_v13 }
 0x569   : > { %2446 = vmatpush3.bf16.msra.mxu0 %v2443_v13 }
 0x56a   : > { %2448 = vmatprep.subr.bf16.mxu0 %v2447_v16 }
 0x56d   : > { %2450 = vmatpush3.bf16.msra.mxu0 %v2447_v16 }
 0x56e   : > { %2452 = vmatprep.subr.bf16.mxu0 %v2451_v19 }
 0x571   : > { %2454 = vmatpush3.bf16.msra.mxu0 %v2451_v19 }
 0x572   : > { %2456 = vmatprep.subr.bf16.mxu0 %v2455_v22 }
 0x575   : > { %2458 = vmatpush3.bf16.msra.mxu0 %v2455_v22 }
 0x578   : > { %2194 = vmatmul.mubr.f32.vlgmr.msra.gmra.mrb[8].mxu0 %v2587_v3 }
 0x62b   : > { %v1236_v24 = vpop.f32.mrb[6].mxu0 }
 0x62c   : > { %v1237_v25 = vadd.f32 %v1236_v24, %v990_v23  ;;  %v2125_v26 = vpop.f32.mrb[7].mxu0 }
 0x62e   : > { %2588 = vtanh.f32 %v1237_v25 }
 0x638   : > { %v2589_v27 = vpop.eup %2588 }
 0x639   : > { %2159 = vmatmul.mubr.f32.vlgmr.msra.gmra.mrb[14].mxu1 %v2589_v27  ;;  %2196 = vmatprep.mubr.f32.mxu0 %v2589_v27 }
 0x64b   : > { %v2195_v29 = vpop.f32.mrb[8].mxu0 }
 0x64c   : > { %v1416_v30 = vadd.f32 %v2195_v29, %v1641_v28  ;;  %v1410_v31 = vpop.f32.mrb[9].mxu0 }
 0x64d   : > { %v1411_v32 = vadd.f32 %v1641_v28, %v1410_v31 }
 0x64e   : > { %1430 = vst [vmem:[%s3180_s21 + $0x8] sm:$0xff] %v1416_v30 }
 0x64f   : > { %1429 = vst [vmem:[%s3180_s21] sm:$0xff] %v1411_v32 }
 0x70c   : > { %v1310_v34 = vpop.f32.mrb[14].mxu1 }
 0x70d   : > { %v1311_v35 = vadd.f32 %v1310_v34, %v995_v33  ;;  %v2160_v36 = vpop.f32.mrb[15].mxu1 }
 0x70f   : > { %2590 = vtanh.f32 %v1311_v35 }
 0x719   : > { %v2591_v37 = vpop.eup %2590 }
 0x71a   : > { %1316 = vst [vmem:[#allocation14 + $0x8] sm:$0xff] %v2591_v37  ;;  %2197 = vmatmul.mubr.f32.gmra.mrb[10].mxu0 %v2591_v37 }
 0x71b   : > { %2747 = shalt.err (!%p2744_p13)
}
 0x71c   : > { %s3515_s23 = sld [smem:[#allocation26_spill]] }
 0x722   : > { %s2748_s17 = scalar_lea.hbm %s3515_s23, 256 }
 0x723   : > { %p2749_p2 = scmp.ne.s32.totalorder %s3515_s23, %s2748_s17  ;;  %p2754_p11 = scmp.lt.u32.totalorder %s2748_s17, %s3515_s23 }
 0x725   : > { %p2750_p12 = pnand %p2749_p2, %p3514_p10 }
 0x727   : > { %p2751_p1 = pneg %p2750_p12 }
 0x729   : > { %p2756_p8 = pnand %p2754_p11, %p2751_p1 }
 0x72b   : > { %2759 = shalt.err (!%p2756_p8)
}
 0x72c   : > { %s2867_s20 = smov 128   ;;  %s2868_s27 = smov 8  }
 0x72d   : > { %2479 = dma.vmem_to_hbm [thread:$0]  (%p3514_p10), %s1464_s16, 256, %s3515_s23, [#allocation15], %s2867_s20, %s2867_s20, %s2868_s27  }
 0x72e   : > { %s1650_s19 = sshll.u32 %s2846_s12, 9  ;;  %s1448_s15 = sshll.u32 %s3180_s21, 4  ;;  %s3415_s15 = int_to_ptr.vmem [resolvable:$true] %s1448_s15 }
 0x72f   : > { %s3516_s24 = sld [smem:[#allocation25_spill]]  ;;  %s1434_s22 = scalar_lea.sflag [#allocation6], %s3162_s9 }
 0x730   : > { %s2760_s16 = scalar_lea.vmem %s3415_s15, 512  ;;  %s2869_s12 = smov [#allocation13]  }
 0x731   : > { %p2761_p6 = scmp.ne.s32.totalorder %s3415_s15, %s2760_s16  ;;  %s2764_s28 = sshll.u32 %s2869_s12, 4  ;;  %s2765_s28 = int_to_ptr.vmem [resolvable:$false] %s2764_s28 }
 0x732   : > { %s2766_s29 = scalar_lea.vmem %s2765_s28, 1024  ;;  %p2767_p9 = scmp.lt.s32.totalorder %s3415_s15, %s2765_s28 }
 0x733   : > { %p2762_p3 = pnand %p2761_p6, %p3104_p5  ;;  %p2768_p0 = scmp.lt.s32.totalorder %s2766_s29, %s2760_s16 }
 0x735   : > { %s3413_s8 = scalar_lea.hbm %s3516_s24, %s1650_s19  ;;  %p2763_p7 = pneg %p2762_p3 }
 0x736   : > { %p2769_p4 = por %p2768_p0, %p2767_p9 }
 0x738   : > { %p2770_p13 = pnand %p2769_p4, %p2763_p7 }
 0x7ed   : > { %v2198_v38 = vpop.f32.mrb[10].mxu0 }
 0x7ee   : > { %v1426_v39 = vadd.f32 %v2198_v38, %v1641_v28  ;;  %v1420_v40 = vpop.f32.mrb[11].mxu0 }
 0x7ef   : > { %v1421_v42 = vadd.f32 %v1641_v28, %v1420_v40 }
 0x7f0   : > { %1432 = vst [vmem:[%s3180_s21 + $0x18] sm:$0xff] %v1426_v39 }
 0x7f1   : > { %1431 = vst [vmem:[%s3180_s21 + $0x10] sm:$0xff] %v1421_v42 }
 0x7f2   : > { %2773 = shalt.err (!%p2770_p13)
}
 0x7f3   : > { %s2774_s21 = scalar_lea.hbm %s3413_s8, 512  ;;  %s2778_s26 = scalar_lea.hbm %s3516_s24, 1024 }
 0x7f4   : > { %p2775_p2 = scmp.ne.s32.totalorder %s3413_s8, %s2774_s21  ;;  %p2779_p11 = scmp.lt.u32.totalorder %s3413_s8, %s3516_s24 }
 0x7f5   : > { %p2780_p8 = scmp.lt.u32.totalorder %s2778_s26, %s2774_s21  ;;  %p2782_p3 = scmp.lt.u32.totalorder %s2774_s21, %s3413_s8 }
 0x7f6   : > { %p2776_p12 = pnand %p2775_p2, %p3104_p5 }
 0x7f7   : > { %p2781_p6 = por %p2780_p8, %p2779_p11 }
 0x7f8   : > { %p2777_p1 = pneg %p2776_p12 }
 0x7f9   : > { %p2783_p7 = por %p2782_p3, %p2781_p6 }
 0x7fb   : > { %p2784_p9 = pnand %p2783_p7, %p2777_p1 }
 0x7fd   : > { %2787 = shalt.err (!%p2784_p9)
}
 0x7fe   : > { %2477 = dma.vmem_to_hbm [thread:$0]  (%p3104_p5), %s3415_s15, 512, %s3413_s8, %s1434_s22, %s2867_s20, %s2867_s20, %s2868_s27  }
 0x7ff   : > { %2825 = dma.done.wait (%p3514_p10), [#allocation15], 256  }
 0x800   : > { %2827 = vsyncadd (%p3514_p10), [#allocation15], 4294967040 }
 0x801 PF: > { %s3517_s16 = sld [smem:[#allocation21_spill]]  ;;  %s3518_s29 = sld [smem:[#allocation22_spill]] }
 0x802   : > { %p3520_p4 = scmp.ge.s32.totalorder %s2854_s14, 2 }
 0x807   : > { %s1482_s21 = sand.u32 1, %s3517_s16   ;;  %p3519_p0 = scmp.ne.s32.totalorder %s3518_s29, 0 }
 0x808   : > { %s1483_s7 = scalar_lea.sflag [#allocation6], %s1482_s21 }
 0x809   : > { %p2501_p13 = pnand %p3520_p4, %p3519_p0 }
 0x80b   : > { %2829 = dma.done.wait (!%p2501_p13), %s1483_s7, 512  }
 0x80c   : > { %2831 = vsyncadd (!%p2501_p13), %s1483_s7, 4294966784  ;;  %s29_s14 = sadd.s32 1, %s2854_s14   ;;  %s3521_s18 = smov %s3528_s30 }
 0x80d   : > { %p26_p2 = scmp.ge.s32.totalorder %s29_s14, 4   ;;  %s3522_s30 = smov %s2838_s10 }
 0x80e   : > { %s3523_s10 = smov %s2842_s11  ;;  %s3524_s11 = smov %s3113_s25 }
 0x80f   : > { %s3525_s12 = smov %s2850_s13  ;;  %s3526_s13 = smov %s3521_s18 }
 0x810   :  { %28 = sbr.rel (!%p26_p2) target bundleno = 14 (0xe), region = 138 }
 0x817   :  { %1488 = vsyncpa [#allocation5], 1 }
 0x818   :  { %1490 = vsyncpa [#allocation5 + $0x1], 1 }
 0x819   :  { %1491 = vsyncpa [#allocation8], 1 }
 0x81a   :  { %1492 = vsyncpa [#allocation11], 1 }
 0x81b   :  { %1493 = vsyncpa [#allocation6], 1 }
 0x81c   :  { %1495 = vsyncpa [#allocation6 + $0x1], 1 }
 0x81d   :  { %1496 = vsyncpa [#allocation15], 1 }

</bundles_post_ra>
